<compile_context>
chip_gen: v6e
topology: v6e:2x2x1
jax: 0.10.0
libtpu: 0.0.40
codegen_flags: <defaults>
</compile_context>

<pallas_src>
import functools
import inspect

import jax
import jax.numpy as jnp
from jax.experimental import pallas as pl
from jax.experimental.pallas import tpu as pltpu


def _round_up(x, m):
    return ((x + m - 1) // m) * m


# ----------------------------------------------------------------------------- kernel
def _transformer_layer_kernel(
    q_ref, k_ref, v_ref,
    wq_ref, bq_ref, wk_ref, bk_ref, wv_ref, bv_ref, wo_ref, bo_ref,
    ln1_w_ref, ln1_b_ref, w1_ref, b1_ref, w2_ref, b2_ref, ln2_w_ref, ln2_b_ref,
    out_ref,
    *, n_heads, d_k, d_model, seq_len, mask, eps):
    R, Dp = q_ref.shape          # R = batches_per_block * seq_len rows, Dp = padded D
    S = seq_len
    bpb = R // S
    D = d_model                  # true model width (= n_heads * d_k); lanes D..Dp are 0

    f32 = jnp.float32
    bf16 = jnp.bfloat16

    q_in = q_ref[...]            # fp32 (R, Dp) -- kept for the residual; pad lanes = 0
    q_bf = q_in.astype(bf16)
    k_bf = k_ref[...]            # already bf16 (cast in the wrapper)
    v_bf = v_ref[...]

    # --- QKV projections.  Separate matmuls because query / key / values are distinct
    # inputs in this module (a single fused (D,3D) weight is only valid for
    # self-attention).  bf16 x bf16 -> fp32 accumulate; output width = true D.
    q_proj = jnp.dot(q_bf, wq_ref[...], preferred_element_type=f32) + bq_ref[...]
    k_proj = jnp.dot(k_bf, wk_ref[...], preferred_element_type=f32) + bk_ref[...]
    v_proj = jnp.dot(v_bf, wv_ref[...], preferred_element_type=f32) + bv_ref[...]

    qh = q_proj.reshape(bpb, S, D).astype(bf16)
    kh = k_proj.reshape(bpb, S, D).astype(bf16)
    vh = v_proj.reshape(bpb, S, D).astype(bf16)

    # Causal mask: attention allowed where triu(ones, k=mask) == 0  <=>  col - row < mask.
    # Built once per grid step and broadcast over (batch, head).
    rowi = jax.lax.broadcasted_iota(jnp.int32, (1, S, S), 1)
    coli = jax.lax.broadcasted_iota(jnp.int32, (1, S, S), 2)
    allowed = (coli - rowi) < mask
    first_row = rowi == 0
    neg_big = f32(-1e30)         # stand-in for -inf; the fully-masked first row
                                 # (mask==0) is zeroed afterwards, matching the ref
    scale = f32(1.0 / (d_k ** 0.5))

    # --- multi-head attention: short static head loop, each head batched over the bpb
    # sequences with leading-batch-dim einsums ('bqd,bkd->bqk').  Per-head contexts are
    # lane-concatenated so the output projection is one D-deep MXU contraction.
    ctx_heads = []
    for h in range(n_heads):
        sl = slice(h * d_k, (h + 1) * d_k)
        s = jnp.einsum("bqd,bkd->bqk", qh[..., sl], kh[..., sl],
                       preferred_element_type=f32) * scale
        s = jnp.where(allowed, s, neg_big)                 # masked_fill(mask==0, -inf)
        s = s - jnp.max(s, axis=-1, keepdims=True)
        e = jnp.exp(s)
        p = e * pl.reciprocal(jnp.sum(e, axis=-1, keepdims=True), approx=True)
        if mask == 0:
            # zero_pad=True: first query row of the attention weights replaced by zeros
            p = jnp.where(first_row, 0.0, p)
        ctx_h = jnp.einsum("bqk,bkd->bqd", p.astype(bf16), vh[..., sl],
                           preferred_element_type=f32)     # (bpb, S, d_k) fp32
        ctx_heads.append(ctx_h.reshape(R, d_k))
    ctx = jnp.concatenate(ctx_heads, axis=-1)               # (R, D) fp32

    # Single output projection, contraction over all heads at once (depth D, not d_k).
    attn_out = jnp.dot(ctx.astype(bf16), wo_ref[...],
                       preferred_element_type=f32) + bo_ref[...]          # (R, Dp)

    inv_d = f32(1.0 / D)

    def layer_norm(x, g, b):
        # One-pass stats; padded lanes of x are zero, so lane sums == true-D sums.
        mu = jnp.sum(x, axis=-1, keepdims=True) * inv_d
        ex2 = jnp.sum(x * x, axis=-1, keepdims=True) * inv_d
        var = ex2 - mu * mu
        return (x - mu) * jax.lax.rsqrt(var + eps) * g + b

    # --- residual + LayerNorm1 (fp32; rsqrt on the EUP) ---
    x = layer_norm(q_in + attn_out, ln1_w_ref[...], ln1_b_ref[...])

    # --- position-wise feed-forward (ReLU), bf16 matmuls / fp32 accumulate ---
    h1 = jnp.dot(x.astype(bf16), w1_ref[...], preferred_element_type=f32) + b1_ref[...]
    h1 = jnp.maximum(h1, 0.0)
    ff = jnp.dot(h1.astype(bf16), w2_ref[...], preferred_element_type=f32) + b2_ref[...]

    # --- residual + LayerNorm2 (fp32) ---
    y = layer_norm(x + ff, ln2_w_ref[...], ln2_b_ref[...])

    out_ref[...] = y.astype(out_ref.dtype)     # lane-dense (R, Dp) store


# ---------------------------------------------------------------------------- wrapper
def _single_buffer_supported():
    """Explicit feature check for pl.Buffered + BlockSpec(pipeline_mode=...)."""
    if not hasattr(pl, "Buffered"):
        return False
    try:
        if "pipeline_mode" in inspect.signature(pl.BlockSpec).parameters:
            return True
    except (TypeError, ValueError):
        pass
    return "pipeline_mode" in getattr(pl.BlockSpec, "__dataclass_fields__", {})


def _valid_batch_blocks(batch, seq_len, row_align=16):
    """Divisors d of `batch` whose row block (d*seq_len) is a multiple of 16 rows
    (bf16 sublane packing for the key/values blocks) or covers the full array
    (full-extent blocks are always legal)."""
    out = []
    for d in range(1, batch + 1):
        if batch % d == 0 and ((d * seq_len) % row_align == 0 or d == batch):
            out.append(d)
    return out or [batch]


def transformer_layer_forward(mask, query, key, values, params, *,
                              n_heads, d_k, eps=1e-5):
    """Pallas implementation of TransformerLayer.forward(mask, query, key, values)."""
    B, S, D = query.shape
    assert D == n_heads * d_k
    d_ff = params["w1"].shape[1]
    Dp = _round_up(D, 128)       # lane-dense model width
    Fp = _round_up(d_ff, 128)    # lane-dense FFN width

    # --- generation detection: v7x has 2 TensorCores and only 64 MiB VMEM/TC.
    try:
        kind = jax.devices()[0].device_kind.lower()
    except Exception:
        kind = ""
    is_v7 = "v7" in kind
    num_tc = 2 if is_v7 else 1
    # Single-TC chips (v5e/v6e): maximize the row block; v7x: smaller default block so
    # the grid can shard across both TensorCores and fit the 64 MiB VMEM.
    target_rows = 512 if is_v7 else 1024

    f32 = jnp.float32
    bf16 = jnp.bfloat16

    def pad_cols(a, c):
        return a if a.shape[1] == c else jnp.pad(a, ((0, 0), (0, c - a.shape[1])))

    def pad_rows(a, r):
        return a if a.shape[0] == r else jnp.pad(a, ((0, r - a.shape[0]), (0, 0)))

    # Activations: flatten batch into rows, lane-pad D -> Dp (padded lanes are zero and
    # stay zero through the layer).  key/values are consumed only as bf16 operands, so
    # cast them wrapper-side; query stays fp32 for the residual.
    q2 = pad_cols(query.reshape(B * S, D).astype(f32), Dp)
    k2 = pad_cols(key.reshape(B * S, D), Dp).astype(bf16)
    v2 = pad_cols(values.reshape(B * S, D), Dp).astype(bf16)

    # Weights: bf16 matmul operands; biases / LayerNorm params stay fp32.  Padding is
    # with zeros so the padded lanes never acquire non-zero values.
    wq = pad_rows(params["wq"], Dp).astype(bf16)          # (Dp, D)
    wk = pad_rows(params["wk"], Dp).astype(bf16)
    wv = pad_rows(params["wv"], Dp).astype(bf16)
    wo = pad_cols(params["wo"], Dp).astype(bf16)          # (D, Dp)
    bo = pad_cols(params["bo"], Dp)
    ln1_w = pad_cols(params["ln1_w"], Dp)
    ln1_b = pad_cols(params["ln1_b"], Dp)
    ln2_w = pad_cols(params["ln2_w"], Dp)
    ln2_b = pad_cols(params["ln2_b"], Dp)
    w1 = pad_cols(pad_rows(params["w1"], Dp), Fp).astype(bf16)   # (Dp, Fp)
    b1 = pad_cols(params["b1"], Fp)
    w2 = pad_cols(pad_rows(params["w2"], Fp), Dp).astype(bf16)   # (Fp, Dp)
    b2 = pad_cols(params["b2"], Dp)

    # --- single-buffer constant weights only when it actually matters and the feature
    # is present (explicit check, no blanket try/except around the build).
    weight_bytes_bf16 = 2 * (3 * Dp * D + D * Dp + Dp * Fp + Fp * Dp)
    single_buffer = _single_buffer_supported() and weight_bytes_bf16 > (4 << 20)
    weight_buffers = 1 if single_buffer else 2

    def vmem_estimate(bpb):
        rows = bpb * S
        w_bytes = weight_bytes_bf16 + 4 * (3 * D + 6 * Dp + 2 * Fp)       # + biases/LN
        act_in = 2 * rows * Dp * (4 + 2 + 2)        # double-buffered q(f32), k,v(bf16)
        act_out = 2 * rows * Dp * 4
        inter = 4 * (3 * rows * D + rows * D + 2 * rows * Dp + rows * Fp)
        inter += 4 * 2 * bpb * S * S * n_heads      # scores/probs (pessimistic)
        return weight_buffers * w_bytes + act_in + act_out + inter

    # --- choose the row block: biggest legal block that fits the VMEM budget; on v7x
    # prefer a grid the two TensorCores can split.
    budget = (44 << 20) if is_v7 else (96 << 20)
    cands = sorted(_valid_batch_blocks(B, S), reverse=True)
    fitting = [d for d in cands if d * S <= target_rows] or [cands[-1]]
    if num_tc > 1:
        pref = [d for d in fitting if (B // d) % num_tc == 0]
        if pref:
            fitting = pref
    bpb = fitting[-1]
    for d in fitting:
        if vmem_estimate(d) <= budget:
            bpb = d
            break
    rows = bpb * S
    grid = (B // bpb,)

    # Always set the scoped VMEM limit from the accounting (v5e's 16 MiB default is the
    # tightest); cap well below v7x's 64 MiB physical VMEM.
    est = vmem_estimate(bpb)
    cap = (48 << 20) if is_v7 else (100 << 20)
    vmem_limit = int(min(cap, max(int(1.5 * est) + (4 << 20), 16 << 20)))

    kernel = functools.partial(
        _transformer_layer_kernel, n_heads=n_heads, d_k=d_k, d_model=D,
        seq_len=S, mask=int(mask), eps=eps)

    row_spec = pl.BlockSpec((rows, Dp), lambda i: (i, 0))

    def const_spec(shape):
        n = len(shape)
        if single_buffer:
            return pl.BlockSpec(shape, lambda i: (0,) * n, pipeline_mode=pl.Buffered(1))
        return pl.BlockSpec(shape, lambda i: (0,) * n)

    in_specs = [
        row_spec, row_spec, row_spec,
        const_spec((Dp, D)), const_spec((1, D)),        # q_linear
        const_spec((Dp, D)), const_spec((1, D)),        # k_linear
        const_spec((Dp, D)), const_spec((1, D)),        # v_linear
        const_spec((D, Dp)), const_spec((1, Dp)),       # out_proj
        const_spec((1, Dp)), const_spec((1, Dp)),       # layer_norm1
        const_spec((Dp, Fp)), const_spec((1, Fp)),      # linear1
        const_spec((Fp, Dp)), const_spec((1, Dp)),      # linear2
        const_spec((1, Dp)), const_spec((1, Dp)),       # layer_norm2
    ]

    out2 = pl.pallas_call(
        kernel,
        out_shape=jax.ShapeDtypeStruct((B * S, Dp), jnp.float32),
        grid_spec=pltpu.PrefetchScalarGridSpec(
            num_scalar_prefetch=0, grid=grid,
            in_specs=in_specs, out_specs=row_spec),
        compiler_params=pltpu.CompilerParams(
            dimension_semantics=("parallel",),
            vmem_limit_bytes=vmem_limit),
    )(q2, k2, v2,
      wq, params["bq"], wk, params["bk"], wv, params["bv"], wo, bo,
      ln1_w, ln1_b, w1, b1, w2, b2, ln2_w, ln2_b)

    return out2[:, :D].reshape(B, S, D)


# -------------------------------------------------------------------------- reference
def reference_forward(mask, query, key, values, params, *, n_heads, d_k, eps=1e-5):
    """Pure-JAX fp32 mirror of the PyTorch module (eval mode), for validation."""
    B, S, D = query.shape
    q = (query @ params["wq"] + params["bq"][0]).reshape(B, S, n_heads, d_k).transpose(0, 2, 1, 3)
    k = (key @ params["wk"] + params["bk"][0]).reshape(B, S, n_heads, d_k).transpose(0, 2, 1, 3)
    v = (values @ params["wv"] + params["bv"][0]).reshape(B, S, n_heads, d_k).transpose(0, 2, 1, 3)
    scores = jnp.einsum("bhqd,bhkd->bhqk", q, k) / (d_k ** 0.5)
    r = jnp.arange(S)[:, None]
    c = jnp.arange(S)[None, :]
    allowed = (c - r) < mask
    scores = jnp.where(allowed, scores, -jnp.inf)
    p = jax.nn.softmax(scores, axis=-1)
    if mask == 0:
        p = p.at[:, :, 0, :].set(0.0)        # zero_pad (also clears the all-masked row's NaNs)
    out = jnp.einsum("bhqk,bhkd->bhqd", p, v).transpose(0, 2, 1, 3).reshape(B, S, D)
    attn = out @ params["wo"] + params["bo"][0]

    def ln(x, w, b):
        mu = x.mean(-1, keepdims=True)
        var = ((x - mu) ** 2).mean(-1, keepdims=True)
        return (x - mu) / jnp.sqrt(var + eps) * w[0] + b[0]

    x = ln(query + attn, params["ln1_w"], params["ln1_b"])
    h = jnp.maximum(x @ params["w1"] + params["b1"][0], 0.0)
    ff = h @ params["w2"] + params["b2"][0]
    return ln(x + ff, params["ln2_w"], params["ln2_b"])


def init_params(key, d_model, d_ff):
    ks = jax.random.split(key, 8)
    n = lambda k, shape, scale: (jax.random.normal(k, shape, jnp.float32) * scale)
    s = 1.0 / (d_model ** 0.5)
    return {
        "wq": n(ks[0], (d_model, d_model), s), "bq": n(ks[1], (1, d_model), 0.01),
        "wk": n(ks[2], (d_model, d_model), s), "bk": n(ks[3], (1, d_model), 0.01),
        "wv": n(ks[4], (d_model, d_model), s), "bv": n(ks[5], (1, d_model), 0.01),
        "wo": n(ks[6], (d_model, d_model), s), "bo": jnp.zeros((1, d_model), jnp.float32),
        "ln1_w": jnp.ones((1, d_model), jnp.float32),
        "ln1_b": jnp.zeros((1, d_model), jnp.float32),
        "w1": n(ks[7], (d_model, d_ff), s), "b1": jnp.zeros((1, d_ff), jnp.float32),
        "w2": n(jax.random.fold_in(key, 99), (d_ff, d_model), 1.0 / (d_ff ** 0.5)),
        "b2": jnp.zeros((1, d_model), jnp.float32),
        "ln2_w": jnp.ones((1, d_model), jnp.float32),
        "ln2_b": jnp.zeros((1, d_model), jnp.float32),
    }


if __name__ == "__main__":
    B, S, d_model, n_heads, d_ff = 2, 8, 32, 4, 64
    d_k = d_model // n_heads

    root = jax.random.PRNGKey(0)
    kq, kk, kv, kp = jax.random.split(root, 4)
    query = jax.random.normal(kq, (B, S, d_model), jnp.float32)
    key = jax.random.normal(kk, (B, S, d_model), jnp.float32)
    values = jax.random.normal(kv, (B, S, d_model), jnp.float32)
    params = init_params(kp, d_model, d_ff)

    for mask in (0, 1):   # mask==0 -> strictly-causal + zero_pad; mask==1 -> causal incl. diagonal
        out = transformer_layer_forward(
            mask, query, key, values, params, n_heads=n_heads, d_k=d_k)
        out = jax.block_until_ready(out)
        ref = reference_forward(
            mask, query, key, values, params, n_heads=n_heads, d_k=d_k)
        assert out.shape == (B, S, d_model)
        # Tolerance reflects bf16-operand / fp32-accumulate matmuls and the approximate
        # (EUP) softmax reciprocal; the reference is pure fp32.
        assert jnp.allclose(out, ref, atol=5e-2, rtol=5e-2), (
            f"mismatch for mask={mask}: max err {jnp.max(jnp.abs(out - ref))}")

    print("KERNEL_OK")
</pallas_src>

<mosaic_0001>
module attributes {stable_mosaic.version = 11 : i64} {
  func.func @_transformer_layer_kernel(%arg0: i32, %arg1: memref<16x128xf32, #tpu.memory_space<vmem>>, %arg2: memref<16x128xbf16, #tpu.memory_space<vmem>>, %arg3: memref<16x128xbf16, #tpu.memory_space<vmem>>, %arg4: memref<128x32xbf16, #tpu.memory_space<vmem>>, %arg5: memref<1x32xf32, #tpu.memory_space<vmem>>, %arg6: memref<128x32xbf16, #tpu.memory_space<vmem>>, %arg7: memref<1x32xf32, #tpu.memory_space<vmem>>, %arg8: memref<128x32xbf16, #tpu.memory_space<vmem>>, %arg9: memref<1x32xf32, #tpu.memory_space<vmem>>, %arg10: memref<32x128xbf16, #tpu.memory_space<vmem>>, %arg11: memref<1x128xf32, #tpu.memory_space<vmem>>, %arg12: memref<1x128xf32, #tpu.memory_space<vmem>>, %arg13: memref<1x128xf32, #tpu.memory_space<vmem>>, %arg14: memref<128x128xbf16, #tpu.memory_space<vmem>>, %arg15: memref<1x128xf32, #tpu.memory_space<vmem>>, %arg16: memref<128x128xbf16, #tpu.memory_space<vmem>>, %arg17: memref<1x128xf32, #tpu.memory_space<vmem>>, %arg18: memref<1x128xf32, #tpu.memory_space<vmem>>, %arg19: memref<1x128xf32, #tpu.memory_space<vmem>>, %arg20: memref<16x128xf32, #tpu.memory_space<vmem>>) attributes {dimension_semantics = [#tpu.dimension_semantics<parallel>], iteration_bounds = array<i64: 1>, scalar_prefetch = 0 : i64, scratch_operands = 0 : i64, tpu.core_type = #tpu.core_type<tc>, window_params = [{transform_indices = @transform_0, window_bounds = array<i64: 16, 128>}, {transform_indices = @transform_1, window_bounds = array<i64: 16, 128>}, {transform_indices = @transform_2, window_bounds = array<i64: 16, 128>}, {pipeline_mode = #tpu.pipeline_mode<synchronous>, transform_indices = @transform_3, window_bounds = array<i64: 128, 32>}, {pipeline_mode = #tpu.pipeline_mode<synchronous>, transform_indices = @transform_4, window_bounds = array<i64: 1, 32>}, {pipeline_mode = #tpu.pipeline_mode<synchronous>, transform_indices = @transform_5, window_bounds = array<i64: 128, 32>}, {pipeline_mode = #tpu.pipeline_mode<synchronous>, transform_indices = @transform_6, window_bounds = array<i64: 1, 32>}, {pipeline_mode = #tpu.pipeline_mode<synchronous>, transform_indices = @transform_7, window_bounds = array<i64: 128, 32>}, {pipeline_mode = #tpu.pipeline_mode<synchronous>, transform_indices = @transform_8, window_bounds = array<i64: 1, 32>}, {pipeline_mode = #tpu.pipeline_mode<synchronous>, transform_indices = @transform_9, window_bounds = array<i64: 32, 128>}, {pipeline_mode = #tpu.pipeline_mode<synchronous>, transform_indices = @transform_10, window_bounds = array<i64: 1, 128>}, {pipeline_mode = #tpu.pipeline_mode<synchronous>, transform_indices = @transform_11, window_bounds = array<i64: 1, 128>}, {pipeline_mode = #tpu.pipeline_mode<synchronous>, transform_indices = @transform_12, window_bounds = array<i64: 1, 128>}, {pipeline_mode = #tpu.pipeline_mode<synchronous>, transform_indices = @transform_13, window_bounds = array<i64: 128, 128>}, {pipeline_mode = #tpu.pipeline_mode<synchronous>, transform_indices = @transform_14, window_bounds = array<i64: 1, 128>}, {pipeline_mode = #tpu.pipeline_mode<synchronous>, transform_indices = @transform_15, window_bounds = array<i64: 128, 128>}, {pipeline_mode = #tpu.pipeline_mode<synchronous>, transform_indices = @transform_16, window_bounds = array<i64: 1, 128>}, {pipeline_mode = #tpu.pipeline_mode<synchronous>, transform_indices = @transform_17, window_bounds = array<i64: 1, 128>}, {pipeline_mode = #tpu.pipeline_mode<synchronous>, transform_indices = @transform_18, window_bounds = array<i64: 1, 128>}, {transform_indices = @transform_19, window_bounds = array<i64: 16, 128>}]} {
    %c0 = arith.constant 0 : index
    %c0_0 = arith.constant 0 : index
    %0 = vector.load %arg1[%c0, %c0_0] : memref<16x128xf32, #tpu.memory_space<vmem>>, vector<16x128xf32>
    %1 = arith.truncf %0 : vector<16x128xf32> to vector<16x128xbf16>
    %c0_1 = arith.constant 0 : index
    %c0_2 = arith.constant 0 : index
    %2 = vector.load %arg2[%c0_1, %c0_2] : memref<16x128xbf16, #tpu.memory_space<vmem>>, vector<16x128xbf16>
    %c0_3 = arith.constant 0 : index
    %c0_4 = arith.constant 0 : index
    %3 = vector.load %arg3[%c0_3, %c0_4] : memref<16x128xbf16, #tpu.memory_space<vmem>>, vector<16x128xbf16>
    %c0_5 = arith.constant 0 : index
    %c0_6 = arith.constant 0 : index
    %4 = vector.load %arg4[%c0_5, %c0_6] : memref<128x32xbf16, #tpu.memory_space<vmem>>, vector<128x32xbf16>
    %cst = arith.constant dense<0.000000e+00> : vector<16x32xf32>
    %5 = tpu.matmul %1, %4, %cst {dimension_numbers = #tpu.dot_dimension_numbers<[1], [0], [0], [1], [0, 0, 1, 1], [], []>} : vector<16x128xbf16>, vector<128x32xbf16>, vector<16x32xf32> -> vector<16x32xf32>
    %c0_7 = arith.constant 0 : index
    %c0_8 = arith.constant 0 : index
    %6 = vector.load %arg5[%c0_7, %c0_8] : memref<1x32xf32, #tpu.memory_space<vmem>>, vector<1x32xf32>
    %7 = vector.broadcast %6 : vector<1x32xf32> to vector<16x32xf32>
    %8 = arith.addf %5, %7 : vector<16x32xf32>
    %c0_9 = arith.constant 0 : index
    %c0_10 = arith.constant 0 : index
    %9 = vector.load %arg6[%c0_9, %c0_10] : memref<128x32xbf16, #tpu.memory_space<vmem>>, vector<128x32xbf16>
    %cst_11 = arith.constant dense<0.000000e+00> : vector<16x32xf32>
    %10 = tpu.matmul %2, %9, %cst_11 {dimension_numbers = #tpu.dot_dimension_numbers<[1], [0], [0], [1], [0, 0, 1, 1], [], []>} : vector<16x128xbf16>, vector<128x32xbf16>, vector<16x32xf32> -> vector<16x32xf32>
    %c0_12 = arith.constant 0 : index
    %c0_13 = arith.constant 0 : index
    %11 = vector.load %arg7[%c0_12, %c0_13] : memref<1x32xf32, #tpu.memory_space<vmem>>, vector<1x32xf32>
    %12 = vector.broadcast %11 : vector<1x32xf32> to vector<16x32xf32>
    %13 = arith.addf %10, %12 : vector<16x32xf32>
    %c0_14 = arith.constant 0 : index
    %c0_15 = arith.constant 0 : index
    %14 = vector.load %arg8[%c0_14, %c0_15] : memref<128x32xbf16, #tpu.memory_space<vmem>>, vector<128x32xbf16>
    %cst_16 = arith.constant dense<0.000000e+00> : vector<16x32xf32>
    %15 = tpu.matmul %3, %14, %cst_16 {dimension_numbers = #tpu.dot_dimension_numbers<[1], [0], [0], [1], [0, 0, 1, 1], [], []>} : vector<16x128xbf16>, vector<128x32xbf16>, vector<16x32xf32> -> vector<16x32xf32>
    %c0_17 = arith.constant 0 : index
    %c0_18 = arith.constant 0 : index
    %16 = vector.load %arg9[%c0_17, %c0_18] : memref<1x32xf32, #tpu.memory_space<vmem>>, vector<1x32xf32>
    %17 = vector.broadcast %16 : vector<1x32xf32> to vector<16x32xf32>
    %18 = arith.addf %15, %17 : vector<16x32xf32>
    %19 = vector.shape_cast %8 : vector<16x32xf32> to vector<2x8x32xf32>
    %20 = arith.truncf %19 : vector<2x8x32xf32> to vector<2x8x32xbf16>
    %21 = vector.shape_cast %13 : vector<16x32xf32> to vector<2x8x32xf32>
    %22 = arith.truncf %21 : vector<2x8x32xf32> to vector<2x8x32xbf16>
    %23 = vector.shape_cast %18 : vector<16x32xf32> to vector<2x8x32xf32>
    %24 = arith.truncf %23 : vector<2x8x32xf32> to vector<2x8x32xbf16>
    %25 = tpu.iota {dimensions = array<i32: 1>} : vector<1x8x8xi32>
    %26 = tpu.iota {dimensions = array<i32: 2>} : vector<1x8x8xi32>
    %27 = arith.subi %26, %25 : vector<1x8x8xi32>
    %c0_i32 = arith.constant 0 : i32
    %28 = vector.broadcast %c0_i32 : i32 to vector<1x8x8xi32>
    %29 = arith.cmpi slt, %27, %28 : vector<1x8x8xi32>
    %c0_i32_19 = arith.constant 0 : i32
    %30 = vector.broadcast %c0_i32_19 : i32 to vector<1x8x8xi32>
    %31 = arith.cmpi eq, %25, %30 : vector<1x8x8xi32>
    %32 = vector.extract_strided_slice %20 {offsets = [0, 0, 0], sizes = [2, 8, 8], strides = [1, 1, 1]} : vector<2x8x32xbf16> to vector<2x8x8xbf16>
    %33 = vector.extract_strided_slice %22 {offsets = [0, 0, 0], sizes = [2, 8, 8], strides = [1, 1, 1]} : vector<2x8x32xbf16> to vector<2x8x8xbf16>
    "tpu.trace_start"() <{level = 10 : i32, message = "bqd,bkd->bqk"}> : () -> ()
    %cst_20 = arith.constant dense<0.000000e+00> : vector<2x8x8xf32>
    %34 = tpu.matmul %32, %33, %cst_20 {dimension_numbers = #tpu.dot_dimension_numbers<[2], [2], [1], [1], [0, 0, 0, 1, 1, 1], [0], [0]>} : vector<2x8x8xbf16>, vector<2x8x8xbf16>, vector<2x8x8xf32> -> vector<2x8x8xf32>
    "tpu.trace_stop"() : () -> ()
    %cst_21 = arith.constant 0.353553385 : f32
    %35 = vector.broadcast %cst_21 : f32 to vector<2x8x8xf32>
    %36 = arith.mulf %34, %35 : vector<2x8x8xf32>
    %cst_22 = arith.constant -1.000000e+30 : f32
    %37 = vector.shape_cast %29 : vector<1x8x8xi1> to vector<1x8x8xi1>
    %38 = vector.broadcast %37 : vector<1x8x8xi1> to vector<2x8x8xi1>
    %39 = vector.broadcast %cst_22 : f32 to vector<2x8x8xf32>
    %40 = arith.select %38, %36, %39 : vector<2x8x8xi1>, vector<2x8x8xf32>
    %cst_23 = arith.constant dense<0xFF800000> : vector<2x8xf32>
    %41 = vector.multi_reduction <maximumf>, %40, %cst_23 [2] : vector<2x8x8xf32> to vector<2x8xf32>
    %42 = vector.shape_cast %41 : vector<2x8xf32> to vector<2x8x1xf32>
    %43 = vector.broadcast %42 : vector<2x8x1xf32> to vector<2x8x8xf32>
    %44 = arith.subf %40, %43 : vector<2x8x8xf32>
    %45 = math.exp %44 : vector<2x8x8xf32>
    %cst_24 = arith.constant dense<0.000000e+00> : vector<2x8xf32>
    %46 = vector.multi_reduction <add>, %45, %cst_24 [2] : vector<2x8x8xf32> to vector<2x8xf32>
    %47 = vector.shape_cast %46 : vector<2x8xf32> to vector<2x8x1xf32>
    %48 = tpu.reciprocal %47 {approx = true} : vector<2x8x1xf32> -> vector<2x8x1xf32>
    %49 = vector.broadcast %48 : vector<2x8x1xf32> to vector<2x8x8xf32>
    %50 = arith.mulf %45, %49 : vector<2x8x8xf32>
    %cst_25 = arith.constant 0.000000e+00 : f32
    %51 = vector.shape_cast %31 : vector<1x8x8xi1> to vector<1x8x8xi1>
    %52 = vector.broadcast %51 : vector<1x8x8xi1> to vector<2x8x8xi1>
    %53 = vector.broadcast %cst_25 : f32 to vector<2x8x8xf32>
    %54 = arith.select %52, %53, %50 : vector<2x8x8xi1>, vector<2x8x8xf32>
    %55 = arith.truncf %54 : vector<2x8x8xf32> to vector<2x8x8xbf16>
    %56 = vector.extract_strided_slice %24 {offsets = [0, 0, 0], sizes = [2, 8, 8], strides = [1, 1, 1]} : vector<2x8x32xbf16> to vector<2x8x8xbf16>
    "tpu.trace_start"() <{level = 10 : i32, message = "bqk,bkd->bqd"}> : () -> ()
    %cst_26 = arith.constant dense<0.000000e+00> : vector<2x8x8xf32>
    %57 = tpu.matmul %55, %56, %cst_26 {dimension_numbers = #tpu.dot_dimension_numbers<[2], [1], [1], [2], [0, 0, 0, 1, 1, 2], [0], [0]>} : vector<2x8x8xbf16>, vector<2x8x8xbf16>, vector<2x8x8xf32> -> vector<2x8x8xf32>
    "tpu.trace_stop"() : () -> ()
    %58 = vector.shape_cast %57 : vector<2x8x8xf32> to vector<16x8xf32>
    %59 = vector.extract_strided_slice %20 {offsets = [0, 0, 8], sizes = [2, 8, 8], strides = [1, 1, 1]} : vector<2x8x32xbf16> to vector<2x8x8xbf16>
    %60 = vector.extract_strided_slice %22 {offsets = [0, 0, 8], sizes = [2, 8, 8], strides = [1, 1, 1]} : vector<2x8x32xbf16> to vector<2x8x8xbf16>
    "tpu.trace_start"() <{level = 10 : i32, message = "bqd,bkd->bqk"}> : () -> ()
    %cst_27 = arith.constant dense<0.000000e+00> : vector<2x8x8xf32>
    %61 = tpu.matmul %59, %60, %cst_27 {dimension_numbers = #tpu.dot_dimension_numbers<[2], [2], [1], [1], [0, 0, 0, 1, 1, 1], [0], [0]>} : vector<2x8x8xbf16>, vector<2x8x8xbf16>, vector<2x8x8xf32> -> vector<2x8x8xf32>
    "tpu.trace_stop"() : () -> ()
    %cst_28 = arith.constant 0.353553385 : f32
    %62 = vector.broadcast %cst_28 : f32 to vector<2x8x8xf32>
    %63 = arith.mulf %61, %62 : vector<2x8x8xf32>
    %cst_29 = arith.constant -1.000000e+30 : f32
    %64 = vector.shape_cast %29 : vector<1x8x8xi1> to vector<1x8x8xi1>
    %65 = vector.broadcast %64 : vector<1x8x8xi1> to vector<2x8x8xi1>
    %66 = vector.broadcast %cst_29 : f32 to vector<2x8x8xf32>
    %67 = arith.select %65, %63, %66 : vector<2x8x8xi1>, vector<2x8x8xf32>
    %cst_30 = arith.constant dense<0xFF800000> : vector<2x8xf32>
    %68 = vector.multi_reduction <maximumf>, %67, %cst_30 [2] : vector<2x8x8xf32> to vector<2x8xf32>
    %69 = vector.shape_cast %68 : vector<2x8xf32> to vector<2x8x1xf32>
    %70 = vector.broadcast %69 : vector<2x8x1xf32> to vector<2x8x8xf32>
    %71 = arith.subf %67, %70 : vector<2x8x8xf32>
    %72 = math.exp %71 : vector<2x8x8xf32>
    %cst_31 = arith.constant dense<0.000000e+00> : vector<2x8xf32>
    %73 = vector.multi_reduction <add>, %72, %cst_31 [2] : vector<2x8x8xf32> to vector<2x8xf32>
    %74 = vector.shape_cast %73 : vector<2x8xf32> to vector<2x8x1xf32>
    %75 = tpu.reciprocal %74 {approx = true} : vector<2x8x1xf32> -> vector<2x8x1xf32>
    %76 = vector.broadcast %75 : vector<2x8x1xf32> to vector<2x8x8xf32>
    %77 = arith.mulf %72, %76 : vector<2x8x8xf32>
    %cst_32 = arith.constant 0.000000e+00 : f32
    %78 = vector.shape_cast %31 : vector<1x8x8xi1> to vector<1x8x8xi1>
    %79 = vector.broadcast %78 : vector<1x8x8xi1> to vector<2x8x8xi1>
    %80 = vector.broadcast %cst_32 : f32 to vector<2x8x8xf32>
    %81 = arith.select %79, %80, %77 : vector<2x8x8xi1>, vector<2x8x8xf32>
    %82 = arith.truncf %81 : vector<2x8x8xf32> to vector<2x8x8xbf16>
    %83 = vector.extract_strided_slice %24 {offsets = [0, 0, 8], sizes = [2, 8, 8], strides = [1, 1, 1]} : vector<2x8x32xbf16> to vector<2x8x8xbf16>
    "tpu.trace_start"() <{level = 10 : i32, message = "bqk,bkd->bqd"}> : () -> ()
    %cst_33 = arith.constant dense<0.000000e+00> : vector<2x8x8xf32>
    %84 = tpu.matmul %82, %83, %cst_33 {dimension_numbers = #tpu.dot_dimension_numbers<[2], [1], [1], [2], [0, 0, 0, 1, 1, 2], [0], [0]>} : vector<2x8x8xbf16>, vector<2x8x8xbf16>, vector<2x8x8xf32> -> vector<2x8x8xf32>
    "tpu.trace_stop"() : () -> ()
    %85 = vector.shape_cast %84 : vector<2x8x8xf32> to vector<16x8xf32>
    %86 = vector.extract_strided_slice %20 {offsets = [0, 0, 16], sizes = [2, 8, 8], strides = [1, 1, 1]} : vector<2x8x32xbf16> to vector<2x8x8xbf16>
    %87 = vector.extract_strided_slice %22 {offsets = [0, 0, 16], sizes = [2, 8, 8], strides = [1, 1, 1]} : vector<2x8x32xbf16> to vector<2x8x8xbf16>
    "tpu.trace_start"() <{level = 10 : i32, message = "bqd,bkd->bqk"}> : () -> ()
    %cst_34 = arith.constant dense<0.000000e+00> : vector<2x8x8xf32>
    %88 = tpu.matmul %86, %87, %cst_34 {dimension_numbers = #tpu.dot_dimension_numbers<[2], [2], [1], [1], [0, 0, 0, 1, 1, 1], [0], [0]>} : vector<2x8x8xbf16>, vector<2x8x8xbf16>, vector<2x8x8xf32> -> vector<2x8x8xf32>
    "tpu.trace_stop"() : () -> ()
    %cst_35 = arith.constant 0.353553385 : f32
    %89 = vector.broadcast %cst_35 : f32 to vector<2x8x8xf32>
    %90 = arith.mulf %88, %89 : vector<2x8x8xf32>
    %cst_36 = arith.constant -1.000000e+30 : f32
    %91 = vector.shape_cast %29 : vector<1x8x8xi1> to vector<1x8x8xi1>
    %92 = vector.broadcast %91 : vector<1x8x8xi1> to vector<2x8x8xi1>
    %93 = vector.broadcast %cst_36 : f32 to vector<2x8x8xf32>
    %94 = arith.select %92, %90, %93 : vector<2x8x8xi1>, vector<2x8x8xf32>
    %cst_37 = arith.constant dense<0xFF800000> : vector<2x8xf32>
    %95 = vector.multi_reduction <maximumf>, %94, %cst_37 [2] : vector<2x8x8xf32> to vector<2x8xf32>
    %96 = vector.shape_cast %95 : vector<2x8xf32> to vector<2x8x1xf32>
    %97 = vector.broadcast %96 : vector<2x8x1xf32> to vector<2x8x8xf32>
    %98 = arith.subf %94, %97 : vector<2x8x8xf32>
    %99 = math.exp %98 : vector<2x8x8xf32>
    %cst_38 = arith.constant dense<0.000000e+00> : vector<2x8xf32>
    %100 = vector.multi_reduction <add>, %99, %cst_38 [2] : vector<2x8x8xf32> to vector<2x8xf32>
    %101 = vector.shape_cast %100 : vector<2x8xf32> to vector<2x8x1xf32>
    %102 = tpu.reciprocal %101 {approx = true} : vector<2x8x1xf32> -> vector<2x8x1xf32>
    %103 = vector.broadcast %102 : vector<2x8x1xf32> to vector<2x8x8xf32>
    %104 = arith.mulf %99, %103 : vector<2x8x8xf32>
    %cst_39 = arith.constant 0.000000e+00 : f32
    %105 = vector.shape_cast %31 : vector<1x8x8xi1> to vector<1x8x8xi1>
    %106 = vector.broadcast %105 : vector<1x8x8xi1> to vector<2x8x8xi1>
    %107 = vector.broadcast %cst_39 : f32 to vector<2x8x8xf32>
    %108 = arith.select %106, %107, %104 : vector<2x8x8xi1>, vector<2x8x8xf32>
    %109 = arith.truncf %108 : vector<2x8x8xf32> to vector<2x8x8xbf16>
    %110 = vector.extract_strided_slice %24 {offsets = [0, 0, 16], sizes = [2, 8, 8], strides = [1, 1, 1]} : vector<2x8x32xbf16> to vector<2x8x8xbf16>
    "tpu.trace_start"() <{level = 10 : i32, message = "bqk,bkd->bqd"}> : () -> ()
    %cst_40 = arith.constant dense<0.000000e+00> : vector<2x8x8xf32>
    %111 = tpu.matmul %109, %110, %cst_40 {dimension_numbers = #tpu.dot_dimension_numbers<[2], [1], [1], [2], [0, 0, 0, 1, 1, 2], [0], [0]>} : vector<2x8x8xbf16>, vector<2x8x8xbf16>, vector<2x8x8xf32> -> vector<2x8x8xf32>
    "tpu.trace_stop"() : () -> ()
    %112 = vector.shape_cast %111 : vector<2x8x8xf32> to vector<16x8xf32>
    %113 = vector.extract_strided_slice %20 {offsets = [0, 0, 24], sizes = [2, 8, 8], strides = [1, 1, 1]} : vector<2x8x32xbf16> to vector<2x8x8xbf16>
    %114 = vector.extract_strided_slice %22 {offsets = [0, 0, 24], sizes = [2, 8, 8], strides = [1, 1, 1]} : vector<2x8x32xbf16> to vector<2x8x8xbf16>
    "tpu.trace_start"() <{level = 10 : i32, message = "bqd,bkd->bqk"}> : () -> ()
    %cst_41 = arith.constant dense<0.000000e+00> : vector<2x8x8xf32>
    %115 = tpu.matmul %113, %114, %cst_41 {dimension_numbers = #tpu.dot_dimension_numbers<[2], [2], [1], [1], [0, 0, 0, 1, 1, 1], [0], [0]>} : vector<2x8x8xbf16>, vector<2x8x8xbf16>, vector<2x8x8xf32> -> vector<2x8x8xf32>
    "tpu.trace_stop"() : () -> ()
    %cst_42 = arith.constant 0.353553385 : f32
    %116 = vector.broadcast %cst_42 : f32 to vector<2x8x8xf32>
    %117 = arith.mulf %115, %116 : vector<2x8x8xf32>
    %cst_43 = arith.constant -1.000000e+30 : f32
    %118 = vector.shape_cast %29 : vector<1x8x8xi1> to vector<1x8x8xi1>
    %119 = vector.broadcast %118 : vector<1x8x8xi1> to vector<2x8x8xi1>
    %120 = vector.broadcast %cst_43 : f32 to vector<2x8x8xf32>
    %121 = arith.select %119, %117, %120 : vector<2x8x8xi1>, vector<2x8x8xf32>
    %cst_44 = arith.constant dense<0xFF800000> : vector<2x8xf32>
    %122 = vector.multi_reduction <maximumf>, %121, %cst_44 [2] : vector<2x8x8xf32> to vector<2x8xf32>
    %123 = vector.shape_cast %122 : vector<2x8xf32> to vector<2x8x1xf32>
    %124 = vector.broadcast %123 : vector<2x8x1xf32> to vector<2x8x8xf32>
    %125 = arith.subf %121, %124 : vector<2x8x8xf32>
    %126 = math.exp %125 : vector<2x8x8xf32>
    %cst_45 = arith.constant dense<0.000000e+00> : vector<2x8xf32>
    %127 = vector.multi_reduction <add>, %126, %cst_45 [2] : vector<2x8x8xf32> to vector<2x8xf32>
    %128 = vector.shape_cast %127 : vector<2x8xf32> to vector<2x8x1xf32>
    %129 = tpu.reciprocal %128 {approx = true} : vector<2x8x1xf32> -> vector<2x8x1xf32>
    %130 = vector.broadcast %129 : vector<2x8x1xf32> to vector<2x8x8xf32>
    %131 = arith.mulf %126, %130 : vector<2x8x8xf32>
    %cst_46 = arith.constant 0.000000e+00 : f32
    %132 = vector.shape_cast %31 : vector<1x8x8xi1> to vector<1x8x8xi1>
    %133 = vector.broadcast %132 : vector<1x8x8xi1> to vector<2x8x8xi1>
    %134 = vector.broadcast %cst_46 : f32 to vector<2x8x8xf32>
    %135 = arith.select %133, %134, %131 : vector<2x8x8xi1>, vector<2x8x8xf32>
    %136 = arith.truncf %135 : vector<2x8x8xf32> to vector<2x8x8xbf16>
    %137 = vector.extract_strided_slice %24 {offsets = [0, 0, 24], sizes = [2, 8, 8], strides = [1, 1, 1]} : vector<2x8x32xbf16> to vector<2x8x8xbf16>
    "tpu.trace_start"() <{level = 10 : i32, message = "bqk,bkd->bqd"}> : () -> ()
    %cst_47 = arith.constant dense<0.000000e+00> : vector<2x8x8xf32>
    %138 = tpu.matmul %136, %137, %cst_47 {dimension_numbers = #tpu.dot_dimension_numbers<[2], [1], [1], [2], [0, 0, 0, 1, 1, 2], [0], [0]>} : vector<2x8x8xbf16>, vector<2x8x8xbf16>, vector<2x8x8xf32> -> vector<2x8x8xf32>
    "tpu.trace_stop"() : () -> ()
    %139 = vector.shape_cast %138 : vector<2x8x8xf32> to vector<16x8xf32>
    %140 = tpu.concatenate %58, %85, %112, %139 in 1 : vector<16x8xf32>, vector<16x8xf32>, vector<16x8xf32>, vector<16x8xf32> -> vector<16x32xf32>
    %141 = arith.truncf %140 : vector<16x32xf32> to vector<16x32xbf16>
    %c0_48 = arith.constant 0 : index
    %c0_49 = arith.constant 0 : index
    %142 = vector.load %arg10[%c0_48, %c0_49] : memref<32x128xbf16, #tpu.memory_space<vmem>>, vector<32x128xbf16>
    %cst_50 = arith.constant dense<0.000000e+00> : vector<16x128xf32>
    %143 = tpu.matmul %141, %142, %cst_50 {dimension_numbers = #tpu.dot_dimension_numbers<[1], [0], [0], [1], [0, 0, 1, 1], [], []>} : vector<16x32xbf16>, vector<32x128xbf16>, vector<16x128xf32> -> vector<16x128xf32>
    %c0_51 = arith.constant 0 : index
    %c0_52 = arith.constant 0 : index
    %144 = vector.load %arg11[%c0_51, %c0_52] : memref<1x128xf32, #tpu.memory_space<vmem>>, vector<1x128xf32>
    %145 = vector.broadcast %144 : vector<1x128xf32> to vector<16x128xf32>
    %146 = arith.addf %143, %145 : vector<16x128xf32>
    %147 = arith.addf %0, %146 : vector<16x128xf32>
    %c0_53 = arith.constant 0 : index
    %c0_54 = arith.constant 0 : index
    %148 = vector.load %arg12[%c0_53, %c0_54] : memref<1x128xf32, #tpu.memory_space<vmem>>, vector<1x128xf32>
    %c0_55 = arith.constant 0 : index
    %c0_56 = arith.constant 0 : index
    %149 = vector.load %arg13[%c0_55, %c0_56] : memref<1x128xf32, #tpu.memory_space<vmem>>, vector<1x128xf32>
    %cst_57 = arith.constant dense<0.000000e+00> : vector<16xf32>
    %150 = vector.multi_reduction <add>, %147, %cst_57 [1] : vector<16x128xf32> to vector<16xf32>
    %151 = vector.shape_cast %150 : vector<16xf32> to vector<16x1xf32>
    %cst_58 = arith.constant 3.125000e-02 : f32
    %152 = vector.broadcast %cst_58 : f32 to vector<16x1xf32>
    %153 = arith.mulf %151, %152 : vector<16x1xf32>
    %154 = arith.mulf %147, %147 : vector<16x128xf32>
    %cst_59 = arith.constant dense<0.000000e+00> : vector<16xf32>
    %155 = vector.multi_reduction <add>, %154, %cst_59 [1] : vector<16x128xf32> to vector<16xf32>
    %156 = vector.shape_cast %155 : vector<16xf32> to vector<16x1xf32>
    %cst_60 = arith.constant 3.125000e-02 : f32
    %157 = vector.broadcast %cst_60 : f32 to vector<16x1xf32>
    %158 = arith.mulf %156, %157 : vector<16x1xf32>
    %159 = arith.mulf %153, %153 : vector<16x1xf32>
    %160 = arith.subf %158, %159 : vector<16x1xf32>
    %161 = vector.broadcast %153 : vector<16x1xf32> to vector<16x128xf32>
    %162 = arith.subf %147, %161 : vector<16x128xf32>
    %cst_61 = arith.constant 9.99999974E-6 : f32
    %163 = vector.broadcast %cst_61 : f32 to vector<16x1xf32>
    %164 = arith.addf %160, %163 : vector<16x1xf32>
    %165 = math.rsqrt %164 : vector<16x1xf32>
    %166 = vector.broadcast %165 : vector<16x1xf32> to vector<16x128xf32>
    %167 = arith.mulf %162, %166 : vector<16x128xf32>
    %168 = vector.broadcast %148 : vector<1x128xf32> to vector<16x128xf32>
    %169 = arith.mulf %167, %168 : vector<16x128xf32>
    %170 = vector.broadcast %149 : vector<1x128xf32> to vector<16x128xf32>
    %171 = arith.addf %169, %170 : vector<16x128xf32>
    %172 = arith.truncf %171 : vector<16x128xf32> to vector<16x128xbf16>
    %c0_62 = arith.constant 0 : index
    %c0_63 = arith.constant 0 : index
    %173 = vector.load %arg14[%c0_62, %c0_63] : memref<128x128xbf16, #tpu.memory_space<vmem>>, vector<128x128xbf16>
    %cst_64 = arith.constant dense<0.000000e+00> : vector<16x128xf32>
    %174 = tpu.matmul %172, %173, %cst_64 {dimension_numbers = #tpu.dot_dimension_numbers<[1], [0], [0], [1], [0, 0, 1, 1], [], []>} : vector<16x128xbf16>, vector<128x128xbf16>, vector<16x128xf32> -> vector<16x128xf32>
    %c0_65 = arith.constant 0 : index
    %c0_66 = arith.constant 0 : index
    %175 = vector.load %arg15[%c0_65, %c0_66] : memref<1x128xf32, #tpu.memory_space<vmem>>, vector<1x128xf32>
    %176 = vector.broadcast %175 : vector<1x128xf32> to vector<16x128xf32>
    %177 = arith.addf %174, %176 : vector<16x128xf32>
    %cst_67 = arith.constant 0.000000e+00 : f32
    %178 = vector.broadcast %cst_67 : f32 to vector<16x128xf32>
    %179 = arith.maximumf %177, %178 : vector<16x128xf32>
    %180 = arith.truncf %179 : vector<16x128xf32> to vector<16x128xbf16>
    %c0_68 = arith.constant 0 : index
    %c0_69 = arith.constant 0 : index
    %181 = vector.load %arg16[%c0_68, %c0_69] : memref<128x128xbf16, #tpu.memory_space<vmem>>, vector<128x128xbf16>
    %cst_70 = arith.constant dense<0.000000e+00> : vector<16x128xf32>
    %182 = tpu.matmul %180, %181, %cst_70 {dimension_numbers = #tpu.dot_dimension_numbers<[1], [0], [0], [1], [0, 0, 1, 1], [], []>} : vector<16x128xbf16>, vector<128x128xbf16>, vector<16x128xf32> -> vector<16x128xf32>
    %c0_71 = arith.constant 0 : index
    %c0_72 = arith.constant 0 : index
    %183 = vector.load %arg17[%c0_71, %c0_72] : memref<1x128xf32, #tpu.memory_space<vmem>>, vector<1x128xf32>
    %184 = vector.broadcast %183 : vector<1x128xf32> to vector<16x128xf32>
    %185 = arith.addf %182, %184 : vector<16x128xf32>
    %186 = arith.addf %171, %185 : vector<16x128xf32>
    %c0_73 = arith.constant 0 : index
    %c0_74 = arith.constant 0 : index
    %187 = vector.load %arg18[%c0_73, %c0_74] : memref<1x128xf32, #tpu.memory_space<vmem>>, vector<1x128xf32>
    %c0_75 = arith.constant 0 : index
    %c0_76 = arith.constant 0 : index
    %188 = vector.load %arg19[%c0_75, %c0_76] : memref<1x128xf32, #tpu.memory_space<vmem>>, vector<1x128xf32>
    %cst_77 = arith.constant dense<0.000000e+00> : vector<16xf32>
    %189 = vector.multi_reduction <add>, %186, %cst_77 [1] : vector<16x128xf32> to vector<16xf32>
    %190 = vector.shape_cast %189 : vector<16xf32> to vector<16x1xf32>
    %cst_78 = arith.constant 3.125000e-02 : f32
    %191 = vector.broadcast %cst_78 : f32 to vector<16x1xf32>
    %192 = arith.mulf %190, %191 : vector<16x1xf32>
    %193 = arith.mulf %186, %186 : vector<16x128xf32>
    %cst_79 = arith.constant dense<0.000000e+00> : vector<16xf32>
    %194 = vector.multi_reduction <add>, %193, %cst_79 [1] : vector<16x128xf32> to vector<16xf32>
    %195 = vector.shape_cast %194 : vector<16xf32> to vector<16x1xf32>
    %cst_80 = arith.constant 3.125000e-02 : f32
    %196 = vector.broadcast %cst_80 : f32 to vector<16x1xf32>
    %197 = arith.mulf %195, %196 : vector<16x1xf32>
    %198 = arith.mulf %192, %192 : vector<16x1xf32>
    %199 = arith.subf %197, %198 : vector<16x1xf32>
    %200 = vector.broadcast %192 : vector<16x1xf32> to vector<16x128xf32>
    %201 = arith.subf %186, %200 : vector<16x128xf32>
    %cst_81 = arith.constant 9.99999974E-6 : f32
    %202 = vector.broadcast %cst_81 : f32 to vector<16x1xf32>
    %203 = arith.addf %199, %202 : vector<16x1xf32>
    %204 = math.rsqrt %203 : vector<16x1xf32>
    %205 = vector.broadcast %204 : vector<16x1xf32> to vector<16x128xf32>
    %206 = arith.mulf %201, %205 : vector<16x128xf32>
    %207 = vector.broadcast %187 : vector<1x128xf32> to vector<16x128xf32>
    %208 = arith.mulf %206, %207 : vector<16x128xf32>
    %209 = vector.broadcast %188 : vector<1x128xf32> to vector<16x128xf32>
    %210 = arith.addf %208, %209 : vector<16x128xf32>
    %c0_82 = arith.constant 0 : index
    %c0_83 = arith.constant 0 : index
    %211 = vector.load %arg20[%c0_82, %c0_83] : memref<16x128xf32, #tpu.memory_space<vmem>>, vector<16x128xf32>
    tpu.vector_store %arg20[%c0_82, %c0_83], %210 {strides = array<i32>} : memref<16x128xf32, #tpu.memory_space<vmem>>, vector<16x128xf32>,
    return
  }
  func.func @transform_0(%arg0: i32) -> (i32, i32) {
    %c0_i32 = arith.constant 0 : i32
    %c0_i32_0 = arith.constant 0 : i32
    return %arg0, %c0_i32 : i32, i32
  }
  func.func @transform_1(%arg0: i32) -> (i32, i32) {
    %c0_i32 = arith.constant 0 : i32
    %c0_i32_0 = arith.constant 0 : i32
    return %arg0, %c0_i32 : i32, i32
  }
  func.func @transform_2(%arg0: i32) -> (i32, i32) {
    %c0_i32 = arith.constant 0 : i32
    %c0_i32_0 = arith.constant 0 : i32
    return %arg0, %c0_i32 : i32, i32
  }
  func.func @transform_3(%arg0: i32) -> (i32, i32) {
    %c0_i32 = arith.constant 0 : i32
    %c0_i32_0 = arith.constant 0 : i32
    %c0_i32_1 = arith.constant 0 : i32
    return %c0_i32, %c0_i32_0 : i32, i32
  }
  func.func @transform_4(%arg0: i32) -> (i32, i32) {
    %c0_i32 = arith.constant 0 : i32
    %c0_i32_0 = arith.constant 0 : i32
    %c0_i32_1 = arith.constant 0 : i32
    return %c0_i32, %c0_i32_0 : i32, i32
  }
  func.func @transform_5(%arg0: i32) -> (i32, i32) {
    %c0_i32 = arith.constant 0 : i32
    %c0_i32_0 = arith.constant 0 : i32
    %c0_i32_1 = arith.constant 0 : i32
    return %c0_i32, %c0_i32_0 : i32, i32
  }
  func.func @transform_6(%arg0: i32) -> (i32, i32) {
    %c0_i32 = arith.constant 0 : i32
    %c0_i32_0 = arith.constant 0 : i32
    %c0_i32_1 = arith.constant 0 : i32
    return %c0_i32, %c0_i32_0 : i32, i32
  }
  func.func @transform_7(%arg0: i32) -> (i32, i32) {
    %c0_i32 = arith.constant 0 : i32
    %c0_i32_0 = arith.constant 0 : i32
    %c0_i32_1 = arith.constant 0 : i32
    return %c0_i32, %c0_i32_0 : i32, i32
  }
  func.func @transform_8(%arg0: i32) -> (i32, i32) {
    %c0_i32 = arith.constant 0 : i32
    %c0_i32_0 = arith.constant 0 : i32
    %c0_i32_1 = arith.constant 0 : i32
    return %c0_i32, %c0_i32_0 : i32, i32
  }
  func.func @transform_9(%arg0: i32) -> (i32, i32) {
    %c0_i32 = arith.constant 0 : i32
    %c0_i32_0 = arith.constant 0 : i32
    %c0_i32_1 = arith.constant 0 : i32
    return %c0_i32, %c0_i32_0 : i32, i32
  }
  func.func @transform_10(%arg0: i32) -> (i32, i32) {
    %c0_i32 = arith.constant 0 : i32
    %c0_i32_0 = arith.constant 0 : i32
    %c0_i32_1 = arith.constant 0 : i32
    return %c0_i32, %c0_i32_0 : i32, i32
  }
  func.func @transform_11(%arg0: i32) -> (i32, i32) {
    %c0_i32 = arith.constant 0 : i32
    %c0_i32_0 = arith.constant 0 : i32
    %c0_i32_1 = arith.constant 0 : i32
    return %c0_i32, %c0_i32_0 : i32, i32
  }
  func.func @transform_12(%arg0: i32) -> (i32, i32) {
    %c0_i32 = arith.constant 0 : i32
    %c0_i32_0 = arith.constant 0 : i32
    %c0_i32_1 = arith.constant 0 : i32
    return %c0_i32, %c0_i32_0 : i32, i32
  }
  func.func @transform_13(%arg0: i32) -> (i32, i32) {
    %c0_i32 = arith.constant 0 : i32
    %c0_i32_0 = arith.constant 0 : i32
    %c0_i32_1 = arith.constant 0 : i32
    return %c0_i32, %c0_i32_0 : i32, i32
  }
  func.func @transform_14(%arg0: i32) -> (i32, i32) {
    %c0_i32 = arith.constant 0 : i32
    %c0_i32_0 = arith.constant 0 : i32
    %c0_i32_1 = arith.constant 0 : i32
    return %c0_i32, %c0_i32_0 : i32, i32
  }
  func.func @transform_15(%arg0: i32) -> (i32, i32) {
    %c0_i32 = arith.constant 0 : i32
    %c0_i32_0 = arith.constant 0 : i32
    %c0_i32_1 = arith.constant 0 : i32
    return %c0_i32, %c0_i32_0 : i32, i32
  }
  func.func @transform_16(%arg0: i32) -> (i32, i32) {
    %c0_i32 = arith.constant 0 : i32
    %c0_i32_0 = arith.constant 0 : i32
    %c0_i32_1 = arith.constant 0 : i32
    return %c0_i32, %c0_i32_0 : i32, i32
  }
  func.func @transform_17(%arg0: i32) -> (i32, i32) {
    %c0_i32 = arith.constant 0 : i32
    %c0_i32_0 = arith.constant 0 : i32
    %c0_i32_1 = arith.constant 0 : i32
    return %c0_i32, %c0_i32_0 : i32, i32
  }
  func.func @transform_18(%arg0: i32) -> (i32, i32) {
    %c0_i32 = arith.constant 0 : i32
    %c0_i32_0 = arith.constant 0 : i32
    %c0_i32_1 = arith.constant 0 : i32
    return %c0_i32, %c0_i32_0 : i32, i32
  }
  func.func @transform_19(%arg0: i32) -> (i32, i32) {
    %c0_i32 = arith.constant 0 : i32
    %c0_i32_0 = arith.constant 0 : i32
    return %arg0, %c0_i32 : i32, i32
  }
}

</mosaic_0001>

<bundles_post_ra>
// kernel: tpu_custom_call.1
= control target key start
LH: loop header
LB: loop body
LE: loop exit
PB: predicated region body
PF: predicated region fallthrough
CT: control target
= control target key end

     0   :  { %s2825_s0 = inlined_call_operand.vmem [shape: f32[16,128], index: 0, kind: input, shape index: {}]   ;;  %s2826_s1 = inlined_call_operand.vmem [shape: bf16[16,128], index: 1, kind: input, shape index: {}]   ;;  %s2827_s2 = inlined_call_operand.vmem [shape: bf16[16,128], index: 2, kind: input, shape index: {}]   ;;  %s2828_s3 = inlined_call_operand.vmem [shape: bf16[128,32], index: 3, kind: input, shape index: {}]   ;;  %s2829_s4 = inlined_call_operand.vmem [shape: f32[1,32], index: 4, kind: input, shape index: {}]   ;;  %s2830_s5 = inlined_call_operand.vmem [shape: bf16[128,32], index: 5, kind: input, shape index: {}]   ;;  %s2831_s6 = inlined_call_operand.vmem [shape: f32[1,32], index: 6, kind: input, shape index: {}]   ;;  %s2832_s7 = inlined_call_operand.vmem [shape: bf16[128,32], index: 7, kind: input, shape index: {}]   ;;  %s2833_s8 = inlined_call_operand.vmem [shape: f32[1,32], index: 8, kind: input, shape index: {}]   ;;  %s2834_s9 = inlined_call_operand.vmem [shape: bf16[32,128], index: 9, kind: input, shape index: {}]   ;;  %s2835_s10 = inlined_call_operand.vmem [shape: f32[1,128], index: 10, kind: input, shape index: {}]   ;;  %s2836_s11 = inlined_call_operand.vmem [shape: f32[1,128], index: 11, kind: input, shape index: {}]   ;;  %s2837_s12 = inlined_call_operand.vmem [shape: f32[1,128], index: 12, kind: input, shape index: {}]   ;;  %s2838_s13 = inlined_call_operand.vmem [shape: bf16[128,128], index: 13, kind: input, shape index: {}]   ;;  %s2839_s14 = inlined_call_operand.vmem [shape: f32[1,128], index: 14, kind: input, shape index: {}]   ;;  %s2840_s15 = inlined_call_operand.vmem [shape: bf16[128,128], index: 15, kind: input, shape index: {}]   ;;  %s2841_s16 = inlined_call_operand.vmem [shape: f32[1,128], index: 16, kind: input, shape index: {}]   ;;  %s2842_s17 = inlined_call_operand.vmem [shape: f32[1,128], index: 17, kind: input, shape index: {}]   ;;  %s2843_s18 = inlined_call_operand.vmem [shape: f32[1,128], index: 18, kind: input, shape index: {}]   ;;  %s2844_s19 = inlined_call_operand.hbm [shape: f32[16,128], index: 19, kind: output, shape index: {}]  }
   0x1   :  { %2847 = sst [smem:[#allocation5_spill]] %s2825_s0 }
   0x2   :  { %2848 = sst [smem:[#allocation6_spill]] %s2826_s1 }
   0x3   :  { %2849 = sst [smem:[#allocation7_spill]] %s2827_s2 }
   0x4   :  { %2850 = sst [smem:[#allocation8_spill]] %s2828_s3 }
   0x5   :  { %v2155_v0 = vld [vmem:[%s2830_s5 + $0x38] sm:$0xff]   ;;  %v2261_v1 = vmov 0.0   ;;  %s2851_s1 = sld [smem:[#allocation8_spill]]  ;;  %v2157_v3 = vld [vmem:[%s2830_s5 + $0x30] sm:$0xff]   ;;  %vm2262_vm0 = vmmov 0   ;;  %v2159_v5 = vld [vmem:[%s2830_s5 + $0x28] sm:$0xff]  }
   0x6   :  { %1946 = vmatprep.subr.bf16.mxu1 %v2261_v1  ;;  %1926 = vmatprep.subr.bf16.mxu0 %v2261_v1  ;;  %v2161_v7 = vld [vmem:[%s2830_s5 + $0x20] sm:$0xff]   ;;  %v2163_v9 = vld [vmem:[%s2830_s5 + $0x18] sm:$0xff]   ;;  %v2165_v11 = vld [vmem:[%s2830_s5 + $0x10] sm:$0xff]   ;;  %s2852_s23 = sld [smem:[#allocation5_spill]] }
   0x7   :  { %1947 = vmatpush3.bf16.msra.mxu1 %v2155_v0  ;;  %1962 = vmatprep.mubr.msk.bf16.mxu1 %vm2262_vm0, %v2261_v1  ;;  %v2167_v13 = vld [vmem:[%s2830_s5 + $0x8] sm:$0xff]   ;;  %v2169_v15 = vld [vmem:[%s2830_s5] sm:$0xff]   ;;  %s2853_s26 = sld [smem:[#allocation6_spill]] }
   0x8   :  { %1948 = vmatprep.subr.bf16.mxu1 %v2261_v1  ;;  %1942 = vmatprep.mubr.msk.bf16.mxu0 %vm2262_vm0, %v2261_v1 }
   0xb   :  { %v2156_v2 = vld [vmem:[%s2851_s1 + $0x38] sm:$0xff]   ;;  %v2158_v4 = vld [vmem:[%s2851_s1 + $0x30] sm:$0xff]   ;;  %1949 = vmatpush3.bf16.msra.mxu1 %v2157_v3  ;;  %v2160_v6 = vld [vmem:[%s2851_s1 + $0x28] sm:$0xff]  }
   0xc   :  { %1927 = vmatpush3.bf16.msra.mxu0 %v2156_v2  ;;  %1950 = vmatprep.subr.bf16.mxu1 %v2261_v1  ;;  %v2162_v8 = vld [vmem:[%s2851_s1 + $0x20] sm:$0xff]   ;;  %v2164_v10 = vld [vmem:[%s2851_s1 + $0x18] sm:$0xff]   ;;  %v2166_v12 = vld [vmem:[%s2851_s1 + $0x10] sm:$0xff]  }
   0xd   :  { %1928 = vmatprep.subr.bf16.mxu0 %v2261_v1  ;;  %v2168_v14 = vld [vmem:[%s2851_s1 + $0x8] sm:$0xff]   ;;  %v2170_v16 = vld [vmem:[%s2851_s1] sm:$0xff]  }
   0xe   :  { %v2440_v17 = vld [vmem:[%s2852_s23] sm:$0xff]  ;;  %v2445_v18 = vld [vmem:[%s2852_s23 + $0x8] sm:$0xff] }
   0xf   :  { %1951 = vmatpush3.bf16.msra.mxu1 %v2159_v5  ;;  %v2171_v19 = vld [vmem:[%s2853_s26] sm:$0xff]   ;;  %v66_v20 = vpack.c.bf16 %v2445_v18, %v2440_v17 }
  0x10   :  { %1929 = vmatpush3.bf16.msra.mxu0 %v2158_v4  ;;  %1952 = vmatprep.subr.bf16.mxu1 %v2261_v1 }
  0x11   :  { %1930 = vmatprep.subr.bf16.mxu0 %v2261_v1 }
  0x13   :  { %1953 = vmatpush3.bf16.msra.mxu1 %v2161_v7 }
  0x14   :  { %1931 = vmatpush3.bf16.msra.mxu0 %v2160_v6  ;;  %1954 = vmatprep.subr.bf16.mxu1 %v2261_v1 }
  0x15   :  { %1932 = vmatprep.subr.bf16.mxu0 %v2261_v1 }
  0x17   :  { %1955 = vmatpush3.bf16.msra.mxu1 %v2163_v9 }
  0x18   :  { %1933 = vmatpush3.bf16.msra.mxu0 %v2162_v8  ;;  %1956 = vmatprep.subr.bf16.mxu1 %v2261_v1 }
  0x19   :  { %1934 = vmatprep.subr.bf16.mxu0 %v2261_v1 }
  0x1b   :  { %1957 = vmatpush3.bf16.msra.mxu1 %v2165_v11 }
  0x1c   :  { %1935 = vmatpush3.bf16.msra.mxu0 %v2164_v10  ;;  %1958 = vmatprep.subr.bf16.mxu1 %v2261_v1 }
  0x1d   :  { %1936 = vmatprep.subr.bf16.mxu0 %v2261_v1 }
  0x1f   :  { %1959 = vmatpush3.bf16.msra.mxu1 %v2167_v13 }
  0x20   :  { %1937 = vmatpush3.bf16.msra.mxu0 %v2166_v12  ;;  %1960 = vmatprep.subr.bf16.mxu1 %v2261_v1 }
  0x21   :  { %1938 = vmatprep.subr.bf16.mxu0 %v2261_v1 }
  0x23   :  { %1961 = vmatpush3.bf16.msra.mxu1 %v2169_v15 }
  0x24   :  { %1939 = vmatpush3.bf16.msra.mxu0 %v2168_v14  ;;  %1986 = vmatprep.subr.bf16.mxu1 %v2261_v1 }
  0x25   :  { %1940 = vmatprep.subr.bf16.mxu0 %v2261_v1 }
  0x26   :  { %1963 = vmatmul.mubr.bf16.vlgmr.msra.gmra.mxu1 %v2171_v19 }
  0x27   :  { %1988 = vmatprep.mubr.msk.bf16.mxu1 %vm2262_vm0, %v2261_v1 }
  0x28   :  { %1941 = vmatpush3.bf16.msra.mxu0 %v2170_v16 }
  0x29   :  { %1966 = vmatprep.subr.bf16.mxu0 %v2261_v1 }
  0x2b   :  { %1943 = vmatmul.mubr.bf16.vlgmr.msra.gmra.mxu0 %v66_v20 }
  0x2c   :  { %1982 = vmatprep.mubr.msk.bf16.mxu0 %vm2262_vm0, %v2261_v1 }
  0x2d   :  { %24 = vsyncpa [#allocation3], 0  ;;  %v1784_v21 = vld [vmem:[%s2831_s6] ss:$0 sm:$0xff]  ;;  %vm432_vm1 = vcmask 64512   ;;  %v2172_v41 = vld [vmem:[%s2832_s7 + $0x38] sm:$0xff]   ;;  %v425_v50 = vlaneseq }
  0x2e   :  { %v1775_v26 = vld [vmem:[%s2829_s4] ss:$0 sm:$0xff]  ;;  %1967 = vmatpush3.bf16.msra.mxu0 %v2172_v41  ;;  %v2173_v42 = vld [vmem:[%s2832_s7 + $0x30] sm:$0xff]   ;;  %v2174_v43 = vld [vmem:[%s2832_s7 + $0x28] sm:$0xff]   ;;  %s2854_s4 = sld [smem:[#allocation7_spill]]  ;;  %vm562_vm3 = vcmask 1043456  }
  0x2f   :  { %1968 = vmatprep.subr.bf16.mxu0 %v2261_v1  ;;  %v2175_v44 = vld [vmem:[%s2832_s7 + $0x20] sm:$0xff]   ;;  %v2176_v45 = vld [vmem:[%s2832_s7 + $0x18] sm:$0xff]   ;;  %v2177_v46 = vld [vmem:[%s2832_s7 + $0x10] sm:$0xff]   ;;  %v2525_v51 = vshrl.u32 %v425_v50, 7  ;;  %v428_v52 = vand.u32 127, %v425_v50  ;;  %s2265_s30 = smov 104  }
  0x30   :  { %v2178_v47 = vld [vmem:[%s2832_s7 + $0x8] sm:$0xff]   ;;  %v2179_v48 = vld [vmem:[%s2832_s7] sm:$0xff]   ;;  %s2263_s7 = smov 120   ;;  %s2266_s20 = smov 8   ;;  %vm1362_vm5 = vcmask 130048   ;;  %vm1365_vm6 = vcmask 195584  }
  0x31   :  { %v429_v53 = vsub.s32 %v428_v52, %v2525_v51  ;;  %v1794_v14 = vld [vmem:[%s2833_s8] ss:$0 sm:$0xff]  ;;  %vm431_vm4 = vcmp.eq.s32.totalorder %v2525_v51, 0  ;;  %s2264_s8 = smov 112   ;;  %s2267_s21 = smov 16   ;;  %vm1392_vm7 = vcmask 261120  }
  0x32   :  { %1969 = vmatpush3.bf16.msra.mxu0 %v2173_v42  ;;  %v2182_v51 = vld [vmem:[%s2834_s9] sm:$0xff]   ;;  %s2268_s25 = smov 24   ;;  %s2269_s24 = smov [#allocation2]  }
  0x33   :  { %1970 = vmatprep.subr.bf16.mxu0 %v2261_v1  ;;  %vm2528_vm2 = vcmp.lt.s32.totalorder %v429_v53, 0 }
  0x34   :  { %v2180_v49 = vld [vmem:[%s2854_s4] sm:$0xff]  }
  0x36   :  { %1971 = vmatpush3.bf16.msra.mxu0 %v2174_v43 }
  0x37   :  { %1972 = vmatprep.subr.bf16.mxu0 %v2261_v1 }
  0x3a   :  { %1973 = vmatpush3.bf16.msra.mxu0 %v2175_v44 }
  0x3b   :  { %1974 = vmatprep.subr.bf16.mxu0 %v2261_v1 }
  0x3e   :  { %1975 = vmatpush3.bf16.msra.mxu0 %v2176_v45 }
  0x3f   :  { %1976 = vmatprep.subr.bf16.mxu0 %v2261_v1 }
  0x42   :  { %1977 = vmatpush3.bf16.msra.mxu0 %v2177_v46 }
  0x43   :  { %1978 = vmatprep.subr.bf16.mxu0 %v2261_v1 }
  0x46   :  { %1979 = vmatpush3.bf16.msra.mxu0 %v2178_v47 }
  0x47   :  { %1980 = vmatprep.subr.bf16.mxu0 %v2261_v1 }
  0x4a   :  { %1981 = vmatpush3.bf16.msra.mxu0 %v2179_v48 }
  0x4b   :  { %2010 = vmatprep.subr.bf16.mxu0 %v2261_v1 }
  0x4d   :  { %1983 = vmatmul.mubr.bf16.vlgmr.msra.gmra.mxu0 %v2180_v49 }
  0x4e   :  { %2012 = vmatprep.mubr.msk.bf16.mxu0 %vm2262_vm0, %v2261_v1 }
  0xe6   :  { %v294_v22 = vpop.f32.mrf.mxu1 }
  0xe7   :  { %v295_v23 = vadd.f32 %v1784_v21, %v294_v22 }
  0xe8   :  { %v1964_v25 = vpop.f32.mrf.mxu1 }
  0xe9   :  { %v2466_v27 = vpack.c.bf16 %v295_v23, %v295_v23 }
  0xea   :  { %v297_v29 = vpop.f32.mrf.mxu1 }
  0xeb   :  { %v176_v24 = vpop.f32.mrf.mxu0  ;;  %v298_v31 = vadd.f32 %v1784_v21, %v297_v29  ;;  %v437_v32 = vsel %vm432_vm1, %v2466_v27, 0 }
  0xec   :  { %v177_v30 = vadd.f32 %v1775_v26, %v176_v24  ;;  %v1965_v34 = vpop.f32.mrf.mxu1  ;;  %1987 = vmatpush3.bf16.xpose.msra.mxu1 %v437_v32 }
  0xed   :  { %v1944_v28 = vpop.f32.mrf.mxu0  ;;  %1992 = vmatprep.subr.bf16.mxu1 %v2261_v1  ;;  %v2473_v37 = vpack.c.bf16 %v298_v31, %v298_v31 }
  0xee   :  { %v2471_v36 = vpack.c.bf16 %v177_v30, %v177_v30 }
  0xef   :  { %v179_v33 = vpop.f32.mrf.mxu0  ;;  %v483_v38 = vsel %vm432_vm1, %v2473_v37, 0 }
  0xf0   :  { %v180_v39 = vadd.f32 %v1775_v26, %v179_v33 }
  0xf1   :  { %v1945_v35 = vpop.f32.mrf.mxu0 }
  0xf2   :  { %v2482_v40 = vpack.c.bf16 %v180_v39, %v180_v39 }
  0xf3   :  { %1989 = vmatmul.mubr.msk.bf16.vlgmr.msra.gmra.mxu1 %vm432_vm1, %v2471_v36 }
  0xf4   :  { %1993 = vmatpush3.bf16.xpose.msra.mxu1 %v483_v38  ;;  %1994 = vmatprep.mubr.msk.bf16.mxu1 %vm2262_vm0, %v2261_v1 }
  0xf5   :  { %1998 = vmatprep.subr.bf16.mxu1 %v2261_v1 }
  0xfb   :  { %1995 = vmatmul.mubr.msk.bf16.vlgmr.msra.gmra.mxu1 %vm432_vm1, %v2482_v40 }
  0xfc   :  { %2000 = vmatprep.mubr.msk.bf16.mxu1 %vm2262_vm0, %v2261_v1 }
 0x10d   :  { %v412_v15 = vpop.f32.mrf.mxu0 }
 0x10e   :  { %v413_v16 = vadd.f32 %v1794_v14, %v412_v15 }
 0x10f   :  { %v1984_v19 = vpop.f32.mrf.mxu0 }
 0x110   :  { %v2548_v20 = vpack.c.bf16 %v413_v16, %v413_v16 }
 0x111   :  { %v415_v23 = vpop.f32.mrf.mxu0 }
 0x112   :  { %v564_v21 = vsel %vm562_vm3, %v2548_v20, 0  ;;  %v416_v24 = vadd.f32 %v1794_v14, %v415_v23 }
 0x113   :  { %1999 = vmatpush3.bf16.msra.mxu1 %v564_v21  ;;  %v1985_v25 = vpop.f32.mrf.mxu0 }
 0x114   :  { %2004 = vmatprep.subr.bf16.mxu1 %v2261_v1  ;;  %v2559_v32 = vpack.c.bf16 %v416_v24, %v416_v24 }
 0x116   :  { %v610_v38 = vsel %vm562_vm3, %v2559_v32, 0 }
 0x1b3   :  { %v473_v54 = vpop.f32.mrf.mxu1 }
 0x1b4   :  { %v525_v56 = vmul.f32 0.35355338, %v473_v54 }
 0x1b5   :  { %v1990_v57 = vpop.f32.mrf.mxu1 }
 0x1b6   :  { %v529_v58 = vsel %vm2528_vm2, %v525_v56, -1e+30 }
 0x1b7   :  { %v476_v59 = vpop.f32.mrf.mxu1  ;;  %v531_v60 = vsel %vm432_vm1, %v529_v58, -inf }
 0x1b8   :  { %532 = vmax.xlane.f32.xlu0 %v531_v60 }
 0x1b9   :  { %v1991_v61 = vpop.f32.mrf.mxu1 }
 0x1bb   :  { %v519_v62 = vpop.f32.mrf.mxu1 }
 0x1bc   :  { %v526_v63 = vmul.f32 0.35355338, %v519_v62 }
 0x1bd   :  { %v1996_v0 = vpop.f32.mrf.mxu1 }
 0x1be   :  { %v530_v2 = vsel %vm2528_vm2, %v526_v63, -1e+30 }
 0x1bf   :  { %v522_v3 = vpop.f32.mrf.mxu1  ;;  %v534_v4 = vsel %vm432_vm1, %v530_v2, -inf }
 0x1c0   :  { %535 = vmax.xlane.f32.xlu0 %v534_v4 }
 0x1c1   :  { %v1997_v5 = vpop.f32.mrf.mxu1 }
 0x1d6   :  { %656 = vrot.lane.b32.xlu0 %v2466_v27, %s2263_s7 }
 0x241   :  { %v533_v6 = vpop.xlane.xlu0 %532 }
 0x242   :  { %v537_v7 = vsub.f32 %v529_v58, %v533_v6 }
 0x244   :  { %v539_v8 = vmul.f32 1.442695, %v537_v7 }
 0x246   :  { %2199 = vpow2.f32 %v539_v8 }
 0x249   :  { %v536_v9 = vpop.xlane.xlu0 %535 }
 0x24a   :  { %v538_v22 = vsub.f32 %v530_v2, %v536_v9 }
 0x24c   :  { %v541_v26 = vmul.f32 1.442695, %v538_v22 }
 0x24d   :  { %v657_v10 = vpop.permute.xlu0 %656 }
 0x24e   :  { %v662_v11 = vsel %vm432_vm1, %v657_v10, 0  ;;  %2201 = vpow2.f32 %v541_v26 }
 0x24f   :  { %2011 = vmatpush3.bf16.xpose.msra.mxu0 %v662_v11 }
 0x250   :  { %2022 = vmatprep.subr.bf16.mxu0 %v2261_v1 }
 0x253   :  { %v2200_v12 = vpop.eup %2199 }
 0x254   :  { %v543_v13 = vsel %vm432_vm1, %v2200_v12, 0.0 }
 0x255   :  { %544 = vadd.xlane.f32.xlu1 %v543_v13 }
 0x25b   :  { %v2202_v28 = vpop.eup %2201 }
 0x25c   :  { %v546_v29 = vsel %vm432_vm1, %v2202_v28, 0.0 }
 0x266   :  { %708 = vrot.lane.b32.xlu1 %v2473_v37, %s2263_s7 }
 0x28a   :  { %547 = vadd.xlane.f32.xlu1 %v546_v29 }
 0x29b   :  { %653 = vrot.lane.b32.xlu1 %v2471_v36, %s2263_s7 }
 0x29f   :  { %705 = vrot.lane.b32.xlu1 %v2482_v40, %s2263_s7 }
 0x2de   :  { %v545_v30 = vpop.xlane.xlu1 %544 }
 0x2df   :  { %2203 = vrcp.f32 %v545_v30 }
 0x2e2   :  { %v709_v39 = vpop.permute.xlu1 %708 }
 0x2e3   :  { %v714_v47 = vsel %vm432_vm1, %v709_v39, 0 }
 0x2ec   :  { %v2204_v31 = vpop.eup %2203 }
 0x2ed   :  { %v551_v33 = vmul.f32 %v2204_v31, %v2200_v12 }
 0x2ef   :  { %v555_v34 = vsel %vm431_vm4, 0.0, %v551_v33 }
 0x2f0   :  { %v557_v35 = vpack.c.bf16 %v555_v34, %v555_v34 }
 0x2f2   :  { %2001 = vmatmul.mubr.msk.bf16.vlgmr.msra.gmra.mxu1 %vm432_vm1, %v557_v35 }
 0x2f3   :  { %2005 = vmatpush3.bf16.msra.mxu1 %v610_v38  ;;  %2006 = vmatprep.mubr.msk.bf16.mxu1 %vm2262_vm0, %v2261_v1 }
 0x2f4   :  { %2016 = vmatprep.subr.bf16.mxu1 %v2261_v1 }
 0x313   :  { %v548_v41 = vpop.xlane.xlu1 %547 }
 0x314   :  { %2205 = vrcp.f32 %v548_v41 }
 0x317   :  { %v654_v42 = vpop.permute.xlu1 %653 }
 0x318   :  { %2013 = vmatmul.mubr.msk.bf16.vlgmr.msra.gmra.mxu0 %vm432_vm1, %v654_v42 }
 0x319   :  { %2024 = vmatprep.mubr.msk.bf16.mxu0 %vm2262_vm0, %v2261_v1 }
 0x31b   :  { %v706_v48 = vpop.permute.xlu1 %705 }
 0x321   :  { %v2206_v43 = vpop.eup %2205 }
 0x322   :  { %v552_v44 = vmul.f32 %v2206_v43, %v2202_v28 }
 0x324   :  { %v556_v45 = vsel %vm431_vm4, 0.0, %v552_v44 }
 0x325   :  { %v558_v46 = vpack.c.bf16 %v556_v45, %v556_v45 }
 0x327   :  { %2007 = vmatmul.mubr.msk.bf16.vlgmr.msra.gmra.mxu1 %vm432_vm1, %v558_v46 }
 0x328   :  { %2017 = vmatpush3.bf16.xpose.msra.mxu1 %v714_v47  ;;  %2018 = vmatprep.mubr.msk.bf16.mxu1 %vm2262_vm0, %v2261_v1 }
 0x329   :  { %2028 = vmatprep.subr.bf16.mxu1 %v2261_v1 }
 0x32f   :  { %2019 = vmatmul.mubr.msk.bf16.vlgmr.msra.gmra.mxu1 %vm432_vm1, %v706_v48 }
 0x330   :  { %2030 = vmatprep.mubr.msk.bf16.mxu1 %vm2262_vm0, %v2261_v1 }
 0x3b2   :  { %v2582_v49 = vpop.f32.mrf.mxu1 }
 0x3b4   :  { %v2002_v50 = vpop.f32.mrf.mxu1 }
 0x3b6   :  { %v603_v52 = vpop.f32.mrf.mxu1 }
 0x3b8   :  { %v2003_v53 = vpop.f32.mrf.mxu1 }
 0x3d8   :  { %v698_v54 = vpop.f32.mrf.mxu0 }
 0x3d9   :  { %v756_v56 = vmul.f32 0.35355338, %v698_v54 }
 0x3da   :  { %v2014_v57 = vpop.f32.mrf.mxu0 }
 0x3db   :  { %v758_v58 = vsel %vm2528_vm2, %v756_v56, -1e+30 }
 0x3dc   :  { %v701_v59 = vpop.f32.mrf.mxu0  ;;  %v760_v60 = vsel %vm432_vm1, %v758_v58, -inf }
 0x3dd   :  { %761 = vmax.xlane.f32.xlu0 %v760_v60 }
 0x3de   :  { %v2015_v61 = vpop.f32.mrf.mxu0 }
 0x3e7   :  { %v2587_v62 = vpop.f32.mrf.mxu1 }
 0x3e9   :  { %v2008_v63 = vpop.f32.mrf.mxu1 }
 0x3eb   :  { %v649_v0 = vpop.f32.mrf.mxu1 }
 0x3ed   :  { %v2009_v2 = vpop.f32.mrf.mxu1 }
 0x3ef   :  { %v750_v3 = vpop.f32.mrf.mxu1 }
 0x3f0   :  { %v757_v4 = vmul.f32 0.35355338, %v750_v3 }
 0x3f1   :  { %v2020_v5 = vpop.f32.mrf.mxu1 }
 0x3f2   :  { %v759_v6 = vsel %vm2528_vm2, %v757_v4, -1e+30 }
 0x3f3   :  { %v753_v7 = vpop.f32.mrf.mxu1  ;;  %v763_v8 = vsel %vm432_vm1, %v759_v6, -inf }
 0x3f4   :  { %764 = vmax.xlane.f32.xlu1 %v763_v8 }
 0x3f5   :  { %v2021_v9 = vpop.f32.mrf.mxu1 }
 0x405   :  { %836 = vrot.lane.b32.xlu1 %v2559_v32, %s2263_s7 }
 0x409   :  { %886 = vrot.lane.b32.xlu1 %v2466_v27, %s2264_s8 }
 0x40d   :  { %936 = vrot.lane.b32.xlu1 %v2473_v37, %s2264_s8 }
 0x411   :  { %934 = vrot.lane.b32.xlu1 %v2482_v40, %s2264_s8 }
 0x466   :  { %v762_v10 = vpop.xlane.xlu0 %761 }
 0x467   :  { %v766_v11 = vsub.f32 %v758_v58, %v762_v10 }
 0x469   :  { %v768_v12 = vmul.f32 1.442695, %v766_v11 }
 0x46b   :  { %2207 = vpow2.f32 %v768_v12 }
 0x478   :  { %v2208_v13 = vpop.eup %2207 }
 0x479   :  { %v772_v14 = vsel %vm432_vm1, %v2208_v13, 0.0 }
 0x47a   :  { %773 = vadd.xlane.f32.xlu0 %v772_v14 }
 0x47d   :  { %v765_v15 = vpop.xlane.xlu1 %764 }
 0x47e   :  { %v767_v16 = vsub.f32 %v759_v6, %v765_v15 }
 0x480   :  { %v770_v19 = vmul.f32 1.442695, %v767_v16 }
 0x481   :  { %v837_v21 = vpop.permute.xlu1 %836 }
 0x482   :  { %2209 = vpow2.f32 %v770_v19  ;;  %v842_v22 = vsel %vm562_vm3, %v837_v21, 0 }
 0x483   :  { %2029 = vmatpush3.bf16.msra.mxu1 %v842_v22 }
 0x484   :  { %2040 = vmatprep.subr.bf16.mxu1 %v2261_v1 }
 0x485   :  { %v887_v34 = vpop.permute.xlu1 %886 }
 0x486   :  { %v892_v38 = vsel %vm432_vm1, %v887_v34, 0 }
 0x489   :  { %v937_v43 = vpop.permute.xlu1 %936 }
 0x48a   :  { %v942_v46 = vsel %vm432_vm1, %v937_v43, 0 }
 0x48d   :  { %v935_v47 = vpop.permute.xlu1 %934 }
 0x48f   :  { %v2210_v23 = vpop.eup %2209 }
 0x490   :  { %v775_v24 = vsel %vm432_vm1, %v2210_v23, 0.0 }
 0x491   :  { %776 = vadd.xlane.f32.xlu0 %v775_v24 }
 0x4a7   :  { %787 = vrot.lane.b32.xlu0 %v2548_v20, %s2263_s7 }
 0x4ab   :  { %884 = vrot.lane.b32.xlu0 %v2471_v36, %s2264_s8 }
 0x503   :  { %v774_v25 = vpop.xlane.xlu0 %773 }
 0x504   :  { %2211 = vrcp.f32 %v774_v25 }
 0x511   :  { %v2212_v26 = vpop.eup %2211 }
 0x512   :  { %v780_v29 = vmul.f32 %v2212_v26, %v2208_v13 }
 0x514   :  { %v782_v31 = vsel %vm431_vm4, 0.0, %v780_v29 }
 0x515   :  { %v784_v35 = vpack.c.bf16 %v782_v31, %v782_v31 }
 0x51a   :  { %v777_v28 = vpop.xlane.xlu0 %776 }
 0x51b   :  { %2213 = vrcp.f32 %v777_v28 }
 0x51e   :  { %v788_v30 = vpop.permute.xlu0 %787 }
 0x51f   :  { %v793_v33 = vsel %vm562_vm3, %v788_v30, 0 }
 0x520   :  { %2023 = vmatpush3.bf16.msra.mxu0 %v793_v33 }
 0x521   :  { %2034 = vmatprep.subr.bf16.mxu0 %v2261_v1 }
 0x522   :  { %v885_v42 = vpop.permute.xlu0 %884 }
 0x523   :  { %2025 = vmatmul.mubr.msk.bf16.vlgmr.msra.gmra.mxu0 %vm432_vm1, %v784_v35 }
 0x524   :  { %2035 = vmatpush3.bf16.xpose.msra.mxu0 %v892_v38  ;;  %2036 = vmatprep.mubr.msk.bf16.mxu0 %vm2262_vm0, %v2261_v1 }
 0x525   :  { %2046 = vmatprep.subr.bf16.mxu0 %v2261_v1 }
 0x528   :  { %v2214_v39 = vpop.eup %2213 }
 0x529   :  { %v781_v41 = vmul.f32 %v2214_v39, %v2210_v23 }
 0x52b   :  { %2037 = vmatmul.mubr.msk.bf16.vlgmr.msra.gmra.mxu0 %vm432_vm1, %v885_v42  ;;  %v783_v44 = vsel %vm431_vm4, 0.0, %v781_v41 }
 0x52c   :  { %v785_v45 = vpack.c.bf16 %v783_v44, %v783_v44  ;;  %2048 = vmatprep.mubr.msk.bf16.mxu0 %vm2262_vm0, %v2261_v1 }
 0x52e   :  { %2031 = vmatmul.mubr.msk.bf16.vlgmr.msra.gmra.mxu1 %vm432_vm1, %v785_v45 }
 0x52f   :  { %2041 = vmatpush3.bf16.xpose.msra.mxu1 %v942_v46  ;;  %2042 = vmatprep.mubr.msk.bf16.mxu1 %vm2262_vm0, %v2261_v1 }
 0x530   :  { %2052 = vmatprep.subr.bf16.mxu1 %v2261_v1 }
 0x536   :  { %2043 = vmatmul.mubr.msk.bf16.vlgmr.msra.gmra.mxu1 %vm432_vm1, %v935_v47 }
 0x537   :  { %2054 = vmatprep.mubr.msk.bf16.mxu1 %vm2262_vm0, %v2261_v1 }
 0x5e3   :  { %v2630_v48 = vpop.f32.mrf.mxu0 }
 0x5e5   :  { %v2026_v50 = vpop.f32.mrf.mxu0 }
 0x5e7   :  { %v832_v52 = vpop.f32.mrf.mxu0 }
 0x5e9   :  { %v2027_v53 = vpop.f32.mrf.mxu0 }
 0x5eb   :  { %v928_v54 = vpop.f32.mrf.mxu0 }
 0x5ec   :  { %v984_v56 = vmul.f32 0.35355338, %v928_v54 }
 0x5ed   :  { %v2038_v57 = vpop.f32.mrf.mxu0 }
 0x5ee   :  { %v2632_v58 = vpop.f32.mrf.mxu1  ;;  %v986_v59 = vsel %vm2528_vm2, %v984_v56, -1e+30 }
 0x5ef   :  { %v2140_v60 = vpack.i.bf16 %v2632_v58, %v2630_v48  ;;  %v931_v61 = vpop.f32.mrf.mxu0  ;;  %v988_v63 = vsel %vm432_vm1, %v986_v59, -inf }
 0x5f0   :  { %v2032_v0 = vpop.f32.mrf.mxu1  ;;  %989 = vmax.xlane.f32.xlu0 %v988_v63 }
 0x5f1   :  { %v2039_v2 = vpop.f32.mrf.mxu0 }
 0x5f2   :  { %v881_v3 = vpop.f32.mrf.mxu1 }
 0x5f4   :  { %v2033_v4 = vpop.f32.mrf.mxu1 }
 0x5f6   :  { %v978_v5 = vpop.f32.mrf.mxu1 }
 0x5f7   :  { %v985_v6 = vmul.f32 0.35355338, %v978_v5 }
 0x5f8   :  { %v2044_v7 = vpop.f32.mrf.mxu1 }
 0x5f9   :  { %v987_v8 = vsel %vm2528_vm2, %v985_v6, -1e+30 }
 0x5fa   :  { %v981_v9 = vpop.f32.mrf.mxu1  ;;  %v991_v10 = vsel %vm432_vm1, %v987_v8, -inf }
 0x5fb   :  { %992 = vmax.xlane.f32.xlu1 %v991_v10 }
 0x5fc   :  { %v2045_v11 = vpop.f32.mrf.mxu1 }
 0x60c   :  { %1062 = vrot.lane.b32.xlu1 %v2559_v32, %s2264_s8 }
 0x610   :  { %1112 = vrot.lane.b32.xlu1 %v2466_v27, %s2265_s30 }
 0x614   :  { %1162 = vrot.lane.b32.xlu1 %v2473_v37, %s2265_s30 }
 0x618   :  { %1160 = vrot.lane.b32.xlu1 %v2482_v40, %s2265_s30 }
 0x679   :  { %v990_v12 = vpop.xlane.xlu0 %989 }
 0x67a   :  { %v994_v13 = vsub.f32 %v986_v59, %v990_v12 }
 0x67c   :  { %v996_v14 = vmul.f32 1.442695, %v994_v13 }
 0x67e   :  { %2215 = vpow2.f32 %v996_v14 }
 0x684   :  { %v993_v15 = vpop.xlane.xlu1 %992 }
 0x685   :  { %v995_v16 = vsub.f32 %v987_v8, %v993_v15 }
 0x687   :  { %v998_v19 = vmul.f32 1.442695, %v995_v16 }
 0x688   :  { %v1063_v21 = vpop.permute.xlu1 %1062 }
 0x689   :  { %2217 = vpow2.f32 %v998_v19  ;;  %v1068_v22 = vsel %vm562_vm3, %v1063_v21, 0 }
 0x68a   :  { %2053 = vmatpush3.bf16.msra.mxu1 %v1068_v22 }
 0x68b   :  { %v2216_v23 = vpop.eup %2215  ;;  %2064 = vmatprep.subr.bf16.mxu1 %v2261_v1 }
 0x68c   :  { %v1000_v27 = vsel %vm432_vm1, %v2216_v23, 0.0  ;;  %v1113_v31 = vpop.permute.xlu1 %1112 }
 0x68d   :  { %1001 = vadd.xlane.f32.xlu0 %v1000_v27  ;;  %v1118_v35 = vsel %vm432_vm1, %v1113_v31, 0 }
 0x690   :  { %v1163_v41 = vpop.permute.xlu1 %1162 }
 0x691   :  { %v1168_v44 = vsel %vm432_vm1, %v1163_v41, 0 }
 0x694   :  { %v1161_v45 = vpop.permute.xlu1 %1160 }
 0x696   :  { %v2218_v37 = vpop.eup %2217 }
 0x697   :  { %v1003_v40 = vsel %vm432_vm1, %v2218_v37, 0.0 }
 0x698   :  { %1004 = vadd.xlane.f32.xlu0 %v1003_v40 }
 0x6ae   :  { %1014 = vrot.lane.b32.xlu0 %v2548_v20, %s2264_s8 }
 0x6b2   :  { %1110 = vrot.lane.b32.xlu0 %v2471_v36, %s2265_s30 }
 0x716   :  { %v1002_v24 = vpop.xlane.xlu0 %1001 }
 0x717   :  { %2219 = vrcp.f32 %v1002_v24 }
 0x721   :  { %v1005_v25 = vpop.xlane.xlu0 %1004 }
 0x722   :  { %2221 = vrcp.f32 %v1005_v25 }
 0x724   :  { %v2220_v26 = vpop.eup %2219 }
 0x725   :  { %v1015_v28 = vpop.permute.xlu0 %1014  ;;  %v1008_v29 = vmul.f32 %v2220_v26, %v2216_v23 }
 0x726   :  { %v1020_v30 = vsel %vm562_vm3, %v1015_v28, 0 }
 0x727   :  { %2047 = vmatpush3.bf16.msra.mxu0 %v1020_v30  ;;  %v1010_v33 = vsel %vm431_vm4, 0.0, %v1008_v29 }
 0x728   :  { %v1012_v34 = vpack.c.bf16 %v1010_v33, %v1010_v33  ;;  %2058 = vmatprep.subr.bf16.mxu0 %v2261_v1  ;;  %v2181_v33 = vld [vmem:[%s2834_s9 + $0x8] sm:$0xff]  }
 0x729   :  { %v1111_v39 = vpop.permute.xlu0 %1110 }
 0x72a   :  { %2049 = vmatmul.mubr.msk.bf16.vlgmr.msra.gmra.mxu0 %vm432_vm1, %v1012_v34 }
 0x72b   :  { %2059 = vmatpush3.bf16.xpose.msra.mxu0 %v1118_v35  ;;  %2060 = vmatprep.mubr.msk.bf16.mxu0 %vm2262_vm0, %v2261_v1 }
 0x72c   :  { %2070 = vmatprep.subr.bf16.mxu0 %v2261_v1 }
 0x72f   :  { %v2222_v36 = vpop.eup %2221 }
 0x730   :  { %v1009_v38 = vmul.f32 %v2222_v36, %v2218_v37 }
 0x732   :  { %2061 = vmatmul.mubr.msk.bf16.vlgmr.msra.gmra.mxu0 %vm432_vm1, %v1111_v39  ;;  %v1011_v42 = vsel %vm431_vm4, 0.0, %v1009_v38 }
 0x733   :  { %v1013_v43 = vpack.c.bf16 %v1011_v42, %v1011_v42  ;;  %2072 = vmatprep.mubr.msk.bf16.mxu0 %vm2262_vm0, %v2261_v1 }
 0x735   :  { %2055 = vmatmul.mubr.msk.bf16.vlgmr.msra.gmra.mxu1 %vm432_vm1, %v1013_v43 }
 0x736   :  { %2065 = vmatpush3.bf16.xpose.msra.mxu1 %v1168_v44  ;;  %2066 = vmatprep.mubr.msk.bf16.mxu1 %vm2262_vm0, %v2261_v1 }
 0x737   :  { %2076 = vmatprep.subr.bf16.mxu1 %v2261_v1 }
 0x73d   :  { %2067 = vmatmul.mubr.msk.bf16.vlgmr.msra.gmra.mxu1 %vm432_vm1, %v1161_v45 }
 0x73e   :  { %2078 = vmatprep.mubr.msk.bf16.mxu1 %vm2262_vm0, %v2261_v1 }
 0x7ea   :  { %v1056_v46 = vpop.f32.mrf.mxu0 }
 0x7ec   :  { %v2050_v47 = vpop.f32.mrf.mxu0 }
 0x7ee   :  { %v1059_v50 = vpop.f32.mrf.mxu0 }
 0x7f0   :  { %v2051_v52 = vpop.f32.mrf.mxu0 }
 0x7f2   :  { %v1154_v53 = vpop.f32.mrf.mxu0 }
 0x7f3   :  { %v1210_v54 = vmul.f32 0.35355338, %v1154_v53 }
 0x7f4   :  { %v2062_v56 = vpop.f32.mrf.mxu0 }
 0x7f5   :  { %v1104_v57 = vpop.f32.mrf.mxu1  ;;  %v1212_v59 = vsel %vm2528_vm2, %v1210_v54, -1e+30 }
 0x7f6   :  { %v1157_v61 = vpop.f32.mrf.mxu0  ;;  %v1214_v63 = vsel %vm432_vm1, %v1212_v59, -inf  ;;  %v2145_v12 = vpack.i.bf16 %v1104_v57, %v1056_v46 }
 0x7f7   :  { %v2056_v0 = vpop.f32.mrf.mxu1  ;;  %1215 = vmax.xlane.f32.xlu0 %v1214_v63 }
 0x7f8   :  { %v2063_v2 = vpop.f32.mrf.mxu0 }
 0x7f9   :  { %v1107_v3 = vpop.f32.mrf.mxu1 }
 0x7fb   :  { %v2057_v4 = vpop.f32.mrf.mxu1 }
 0x7fd   :  { %v1204_v5 = vpop.f32.mrf.mxu1 }
 0x7fe   :  { %v1211_v6 = vmul.f32 0.35355338, %v1204_v5  ;;  %v1820_v5 = vld [vmem:[%s2835_s10] ss:$0 sm:$0xff] }
 0x7ff   :  { %v2068_v7 = vpop.f32.mrf.mxu1 }
 0x800   :  { %v1213_v8 = vsel %vm2528_vm2, %v1211_v6, -1e+30 }
 0x801   :  { %v1207_v9 = vpop.f32.mrf.mxu1  ;;  %v1217_v10 = vsel %vm432_vm1, %v1213_v8, -inf }
 0x802   :  { %1218 = vmax.xlane.f32.xlu1 %v1217_v10 }
 0x803   :  { %v2069_v11 = vpop.f32.mrf.mxu1 }
 0x813   :  { %1288 = vrot.lane.b32.xlu1 %v2559_v32, %s2265_s30 }
 0x817   :  { %2141 = vrot.lane.b32.xlu1 %v2140_v60, %s2266_s20 }
 0x81b   :  { %2146 = vrot.lane.b32.xlu1 %v2145_v12, %s2267_s21 }
 0x880   :  { %v1216_v13 = vpop.xlane.xlu0 %1215 }
 0x881   :  { %v1220_v55 = vsub.f32 %v1212_v59, %v1216_v13 }
 0x883   :  { %v1222_v14 = vmul.f32 1.442695, %v1220_v55  ;;  %v2184_v55 = vld [vmem:[%s2838_s13 + $0x30] sm:$0xff]  }
 0x885   :  { %2223 = vpow2.f32 %v1222_v14  ;;  %v2186_v14 = vld [vmem:[%s2838_s13 + $0x20] sm:$0xff]  }
 0x88b   :  { %v1219_v15 = vpop.xlane.xlu1 %1218 }
 0x88c   :  { %v1221_v16 = vsub.f32 %v1213_v8, %v1219_v15  ;;  %v2187_v15 = vld [vmem:[%s2838_s13 + $0x18] sm:$0xff]  }
 0x88e   :  { %v1224_v19 = vmul.f32 1.442695, %v1221_v16  ;;  %v2188_v16 = vld [vmem:[%s2838_s13 + $0x10] sm:$0xff]  }
 0x88f   :  { %v1289_v21 = vpop.permute.xlu1 %1288 }
 0x890   :  { %2225 = vpow2.f32 %v1224_v19  ;;  %v1294_v32 = vsel %vm562_vm3, %v1289_v21, 0  ;;  %v2189_v19 = vld [vmem:[%s2838_s13 + $0x8] sm:$0xff]   ;;  %v2190_v21 = vld [vmem:[%s2838_s13] sm:$0xff]  }
 0x891   :  { %2077 = vmatpush3.bf16.msra.mxu1 %v1294_v32  ;;  %v2191_v32 = vld [vmem:[%s2840_s15 + $0x38] sm:$0xff]  }
 0x892   :  { %v2224_v22 = vpop.eup %2223  ;;  %2090 = vmatprep.subr.bf16.mxu1 %v2261_v1 }
 0x893   :  { %v1226_v48 = vsel %vm432_vm1, %v2224_v22, 0.0  ;;  %v2142_v45 = vpop.permute.xlu1 %2141 }
 0x894   :  { %1227 = vadd.xlane.f32.xlu0 %v1226_v48  ;;  %v2144_v47 = vunpack.i.h.bf16 %v2142_v45  ;;  %v2143_v50 = vunpack.i.l.bf16 %v2142_v45  ;;  %v2193_v48 = vld [vmem:[%s2840_s15 + $0x28] sm:$0xff]  }
 0x896   :  { %v1361_v56 = vsel %vm432_vm1, %v2587_v62, %v2144_v47  ;;  %v1360_v57 = vsel %vm432_vm1, %v2582_v49, %v2143_v50 }
 0x897   :  { %v2147_v46 = vpop.permute.xlu1 %2146 }
 0x898   :  { %v2149_v52 = vunpack.i.h.bf16 %v2147_v46  ;;  %v2148_v53 = vunpack.i.l.bf16 %v2147_v46 }
 0x89a   :  { %v1364_v63 = vsel %vm1362_vm5, %v1361_v56, %v2149_v52  ;;  %v1363_v0 = vsel %vm1362_vm5, %v1360_v57, %v2148_v53  ;;  %v2196_v52 = vld [vmem:[%s2840_s15 + $0x10] sm:$0xff]   ;;  %v2197_v53 = vld [vmem:[%s2840_s15 + $0x8] sm:$0xff]   ;;  %v1826_v56 = vld [vmem:[%s2839_s14] ss:$0 sm:$0xff] }
 0x89d   :  { %v2226_v58 = vpop.eup %2225 }
 0x89e   :  { %v1229_v60 = vsel %vm432_vm1, %v2226_v58, 0.0 }
 0x89f   :  { %1230 = vadd.xlane.f32.xlu0 %v1229_v60  ;;  %v2195_v60 = vld [vmem:[%s2840_s15 + $0x18] sm:$0xff]  }
 0x8b5   :  { %1240 = vrot.lane.b32.xlu0 %v2548_v20, %s2265_s30 }
 0x91d   :  { %v1228_v23 = vpop.xlane.xlu0 %1227 }
 0x91e   :  { %2227 = vrcp.f32 %v1228_v23 }
 0x928   :  { %v1231_v27 = vpop.xlane.xlu0 %1230 }
 0x929   :  { %2229 = vrcp.f32 %v1231_v27 }
 0x92b   :  { %v2228_v37 = vpop.eup %2227 }
 0x92c   :  { %v1241_v40 = vpop.permute.xlu0 %1240  ;;  %v1234_v24 = vmul.f32 %v2228_v37, %v2224_v22  ;;  %v2192_v22 = vld [vmem:[%s2840_s15 + $0x30] sm:$0xff]  }
 0x92d   :  { %v1246_v25 = vsel %vm562_vm3, %v1241_v40, 0 }
 0x92e   :  { %2071 = vmatpush3.bf16.msra.mxu0 %v1246_v25  ;;  %v1236_v26 = vsel %vm431_vm4, 0.0, %v1234_v24 }
 0x92f   :  { %v1238_v28 = vpack.c.bf16 %v1236_v26, %v1236_v26  ;;  %2082 = vmatprep.subr.bf16.mxu0 %v2261_v1 }
 0x931   :  { %2073 = vmatmul.mubr.msk.bf16.vlgmr.msra.gmra.mxu0 %vm432_vm1, %v1238_v28 }
 0x932   :  { %2086 = vmatprep.mubr.msk.bf16.mxu0 %vm2262_vm0, %v2261_v1  ;;  %2083 = vmatpush3.bf16.msra.mxu0 %v2181_v33 }
 0x933   :  { %2084 = vmatprep.subr.bf16.mxu0 %v2261_v1 }
 0x936   :  { %v2230_v20 = vpop.eup %2229  ;;  %2085 = vmatpush3.bf16.msra.mxu0 %v2182_v51 }
 0x937   :  { %v1235_v29 = vmul.f32 %v2230_v20, %v2226_v58  ;;  %2110 = vmatprep.subr.bf16.mxu0 %v2261_v1  ;;  %v2194_v58 = vld [vmem:[%s2840_s15 + $0x20] sm:$0xff]  }
 0x939   :  { %v1237_v30 = vsel %vm431_vm4, 0.0, %v1235_v29 }
 0x93a   :  { %v1239_v31 = vpack.c.bf16 %v1237_v30, %v1237_v30 }
 0x93c   :  { %2079 = vmatmul.mubr.msk.bf16.vlgmr.msra.gmra.mxu1 %vm432_vm1, %v1239_v31 }
 0x93d   :  { %2106 = vmatprep.mubr.msk.bf16.mxu1 %vm2262_vm0, %v2261_v1 }
 0x9f1   :  { %v1282_v34 = vpop.f32.mrf.mxu0 }
 0x9f3   :  { %v2074_v35 = vpop.f32.mrf.mxu0 }
 0x9f5   :  { %v1285_v36 = vpop.f32.mrf.mxu0 }
 0x9f7   :  { %v2075_v38 = vpop.f32.mrf.mxu0 }
 0x9f8   :  { %v1824_v38 = vld [vmem:[%s2836_s11] ss:$0 sm:$0xff] }
 0x9fc   :  { %v1330_v39 = vpop.f32.mrf.mxu1 }
 0x9fd   :  { %v2150_v41 = vpack.i.bf16 %v1330_v39, %v1282_v34 }
 0x9fe   :  { %v2080_v42 = vpop.f32.mrf.mxu1 }
 0x9ff   :  { %2151 = vrot.lane.b32.xlu0 %v2150_v41, %s2268_s25  ;;  %s1764_s25 = sshll.u32 %s2269_s24, 4  ;;  %s1765_s25 = int_to_ptr.vmem [resolvable:$true] %s1764_s25 }
 0xa00   :  { %v1333_v43 = vpop.f32.mrf.mxu1  ;;  %s2239_s9 = scalar_lea.vmem %s1765_s25, 256  ;;  %p2244_p1 = scmp.lt.s32.totalorder %s1765_s25, %s1765_s25 }
 0xa01   :  { %p2240_p0 = scmp.ne.s32.totalorder %s1765_s25, %s2239_s9  ;;  %p2245_p2 = scmp.lt.s32.totalorder %s2239_s9, %s2239_s9 }
 0xa02   :  { %v2081_v44 = vpop.f32.mrf.mxu1 }
 0xa03   :  { %v1825_v44 = vld [vmem:[%s2837_s12] ss:$0 sm:$0xff]  ;;  %p2246_p3 = por %p2245_p2, %p2244_p1 }
 0xa05   :  { %p2247_p4 = pnand %p2246_p3, %p2240_p0 }
 0xa71   :  { %v2152_v54 = vpop.permute.xlu0 %2151 }
 0xa72   :  { %v2154_v59 = vunpack.i.h.bf16 %v2152_v54  ;;  %v2153_v61 = vunpack.i.l.bf16 %v2152_v54  ;;  %v2198_v54 = vld [vmem:[%s2840_s15] sm:$0xff]  }
 0xa74   :  { %v1367_v2 = vsel %vm1365_vm6, %v1364_v63, %v2154_v59  ;;  %v1366_v3 = vsel %vm1365_vm6, %v1363_v0, %v2153_v61 }
 0xa75   :  { %v1368_v4 = vpack.c.bf16 %v1367_v2, %v1366_v3 }
 0xa77   :  { %2087 = vmatmul.mubr.msk.bf16.vlgmr.msra.gmra.mxu0 %vm1392_vm7, %v1368_v4 }
 0xa78   :  { %2126 = vmatprep.mubr.msk.bf16.mxu0 %vm2262_vm0, %v2261_v1  ;;  %2111 = vmatpush3.bf16.msra.mxu0 %v2191_v32 }
 0xa79   :  { %2112 = vmatprep.subr.bf16.mxu0 %v2261_v1 }
 0xa7c   :  { %2113 = vmatpush3.bf16.msra.mxu0 %v2192_v22 }
 0xa7d   :  { %2114 = vmatprep.subr.bf16.mxu0 %v2261_v1 }
 0xa80   :  { %2115 = vmatpush3.bf16.msra.mxu0 %v2193_v48 }
 0xa81   :  { %2116 = vmatprep.subr.bf16.mxu0 %v2261_v1 }
 0xa84   :  { %2117 = vmatpush3.bf16.msra.mxu0 %v2194_v58 }
 0xa85   :  { %2118 = vmatprep.subr.bf16.mxu0 %v2261_v1 }
 0xa88   :  { %2119 = vmatpush3.bf16.msra.mxu0 %v2195_v60 }
 0xa89   :  { %2120 = vmatprep.subr.bf16.mxu0 %v2261_v1 }
 0xa8c   :  { %2121 = vmatpush3.bf16.msra.mxu0 %v2196_v52 }
 0xa8d   :  { %2122 = vmatprep.subr.bf16.mxu0 %v2261_v1 }
 0xa90   :  { %2123 = vmatpush3.bf16.msra.mxu0 %v2197_v53 }
 0xa91   :  { %2124 = vmatprep.subr.bf16.mxu0 %v2261_v1 }
 0xa94   :  { %2125 = vmatpush3.bf16.msra.mxu0 %v2198_v54 }
 0xb37   :  { %v1430_v62 = vpop.f32.mrf.mxu0 }
 0xb38   :  { %v1431_v6 = vadd.f32 %v1820_v5, %v1430_v62 }
 0xb39   :  { %v2088_v7 = vpop.f32.mrf.mxu0 }
 0xb3a   :  { %v2728_v49 = vadd.f32 %v1431_v6, %v2440_v17  ;;  %v2183_v17 = vld [vmem:[%s2838_s13 + $0x38] sm:$0xff]  }
 0xb3b   :  { %v1433_v8 = vpop.f32.mrf.mxu0  ;;  %2091 = vmatpush3.bf16.msra.mxu1 %v2183_v17 }
 0xb3c   :  { %v1434_v9 = vadd.f32 %v1820_v5, %v1433_v8  ;;  %1441 = vadd.xlane.f32.xlu1 %v2728_v49  ;;  %v1447_v10 = vmul.f32 %v2728_v49, %v2728_v49  ;;  %2092 = vmatprep.subr.bf16.mxu1 %v2261_v1 }
 0xb3d   :  { %v2089_v11 = vpop.f32.mrf.mxu0 }
 0xb3e   :  { %1449 = vadd.xlane.f32.xlu0 %v1447_v10  ;;  %v2734_v12 = vadd.f32 %v1434_v9, %v2445_v18  ;;  %v2185_v18 = vld [vmem:[%s2838_s13 + $0x28] sm:$0xff]  }
 0xb3f   :  { %2093 = vmatpush3.bf16.msra.mxu1 %v2184_v55 }
 0xb40   :  { %v1448_v13 = vmul.f32 %v2734_v12, %v2734_v12  ;;  %2094 = vmatprep.subr.bf16.mxu1 %v2261_v1 }
 0xb42   :  { %1443 = vadd.xlane.f32.xlu0 %v2734_v12 }
 0xb43   :  { %2095 = vmatpush3.bf16.msra.mxu1 %v2185_v18 }
 0xb44   :  { %2096 = vmatprep.subr.bf16.mxu1 %v2261_v1 }
 0xb46   :  { %1451 = vadd.xlane.f32.xlu0 %v1448_v13 }
 0xb47   :  { %2097 = vmatpush3.bf16.msra.mxu1 %v2186_v14 }
 0xb48   :  { %2098 = vmatprep.subr.bf16.mxu1 %v2261_v1 }
 0xb4b   :  { %2099 = vmatpush3.bf16.msra.mxu1 %v2187_v15 }
 0xb4c   :  { %2100 = vmatprep.subr.bf16.mxu1 %v2261_v1 }
 0xb4f   :  { %2101 = vmatpush3.bf16.msra.mxu1 %v2188_v16 }
 0xb50   :  { %2102 = vmatprep.subr.bf16.mxu1 %v2261_v1 }
 0xb53   :  { %2103 = vmatpush3.bf16.msra.mxu1 %v2189_v19 }
 0xb54   :  { %2104 = vmatprep.subr.bf16.mxu1 %v2261_v1  ;;  %v1835_v1 = vld [vmem:[%s2841_s16] ss:$0 sm:$0xff] }
 0xb57   :  { %2105 = vmatpush3.bf16.msra.mxu1 %v2190_v21 }
 0xbc5   :  { %v1442_v23 = vpop.xlane.xlu1 %1441 }
 0xbc6   :  { %v1445_v27 = vmul.f32 0.03125, %v1442_v23 }
 0xbc7   :  { %v1450_v37 = vpop.xlane.xlu0 %1449 }
 0xbc8   :  { %v1455_v40 = vmul.f32 %v1445_v27, %v1445_v27  ;;  %v1453_v24 = vmul.f32 0.03125, %v1450_v37  ;;  %v1459_v51 = vsub.f32 %v2728_v49, %v1445_v27 }
 0xbca   :  { %v1457_v25 = vsub.f32 %v1453_v24, %v1455_v40  ;;  %v1844_v40 = vld [vmem:[%s2842_s17] ss:$0 sm:$0xff] }
 0xbcb   :  { %v1444_v26 = vpop.xlane.xlu0 %1443 }
 0xbcc   :  { %v1461_v28 = vadd.f32 1e-05, %v1457_v25  ;;  %v1446_v20 = vmul.f32 0.03125, %v1444_v26  ;;  %v1845_v25 = vld [vmem:[%s2843_s18] ss:$0 sm:$0xff] }
 0xbce   :  { %2231 = vrsqrt.f32 %v1461_v28  ;;  %v1456_v30 = vmul.f32 %v1446_v20, %v1446_v20  ;;  %v1460_v39 = vsub.f32 %v2734_v12, %v1446_v20 }
 0xbcf   :  { %v1452_v29 = vpop.xlane.xlu0 %1451 }
 0xbd0   :  { %v1454_v31 = vmul.f32 0.03125, %v1452_v29 }
 0xbd2   :  { %v1458_v33 = vsub.f32 %v1454_v31, %v1456_v30 }
 0xbd4   :  { %v1462_v34 = vadd.f32 1e-05, %v1458_v33 }
 0xbd6   :  { %2233 = vrsqrt.f32 %v1462_v34 }
 0xbdb   :  { %v2232_v35 = vpop.eup %2231 }
 0xbdc   :  { %v1465_v36 = vmul.f32 %v2232_v35, %v1459_v51 }
 0xbde   :  { %v1473_v43 = vmul.f32 %v1824_v38, %v1465_v36 }
 0xbe0   :  { %v1481_v46 = vadd.f32 %v1825_v44, %v1473_v43 }
 0xbe3   :  { %v2234_v41 = vpop.eup %2233 }
 0xbe4   :  { %v1466_v42 = vmul.f32 %v2234_v41, %v1460_v39 }
 0xbe6   :  { %v1474_v45 = vmul.f32 %v1824_v38, %v1466_v42 }
 0xbe8   :  { %v1482_v47 = vadd.f32 %v1825_v44, %v1474_v45 }
 0xbea   :  { %v1483_v50 = vpack.c.bf16 %v1482_v47, %v1481_v46 }
 0xbec   :  { %2107 = vmatmul.mubr.bf16.vlgmr.msra.gmra.mxu1 %v1483_v50 }
 0xcac   :  { %v1589_v57 = vpop.f32.mrf.mxu1 }
 0xcad   :  { %v1590_v61 = vadd.f32 %v1826_v56, %v1589_v57 }
 0xcae   :  { %v2108_v59 = vpop.f32.mrf.mxu1 }
 0xcaf   :  { %v1596_v3 = vmax.f32 %v1590_v61, 0.0 }
 0xcb0   :  { %v1592_v63 = vpop.f32.mrf.mxu1 }
 0xcb1   :  { %v1593_v0 = vadd.f32 %v1826_v56, %v1592_v63 }
 0xcb2   :  { %v2109_v2 = vpop.f32.mrf.mxu1 }
 0xcb3   :  { %v1597_v4 = vmax.f32 %v1593_v0, 0.0 }
 0xcb5   :  { %v1598_v5 = vpack.c.bf16 %v1597_v4, %v1596_v3 }
 0xcb7   :  { %2127 = vmatmul.mubr.bf16.vlgmr.msra.gmra.mxu0 %v1598_v5 }
 0xd77   :  { %v1704_v62 = vpop.f32.mrf.mxu0 }
 0xd78   :  { %v1705_v6 = vadd.f32 %v1835_v1, %v1704_v62 }
 0xd79   :  { %v2128_v7 = vpop.f32.mrf.mxu0 }
 0xd7a   :  { %v1711_v49 = vadd.f32 %v1705_v6, %v1481_v46 }
 0xd7b   :  { %v1707_v8 = vpop.f32.mrf.mxu0 }
 0xd7c   :  { %v1708_v9 = vadd.f32 %v1835_v1, %v1707_v8  ;;  %1715 = vadd.xlane.f32.xlu1 %v1711_v49  ;;  %v1721_v12 = vmul.f32 %v1711_v49, %v1711_v49 }
 0xd7d   :  { %v2129_v10 = vpop.f32.mrf.mxu0 }
 0xd7e   :  { %v1712_v11 = vadd.f32 %v1708_v9, %v1482_v47 }
 0xd80   :  { %1723 = vadd.xlane.f32.xlu1 %v1721_v12  ;;  %1717 = vadd.xlane.f32.xlu0 %v1712_v11  ;;  %v1722_v13 = vmul.f32 %v1712_v11, %v1712_v11 }
 0xd84   :  { %1725 = vadd.xlane.f32.xlu0 %v1722_v13 }
 0xe05   :  { %v1716_v17 = vpop.xlane.xlu1 %1715 }
 0xe06   :  { %v1719_v55 = vmul.f32 0.03125, %v1716_v17 }
 0xe08   :  { %v1729_v15 = vmul.f32 %v1719_v55, %v1719_v55  ;;  %v1733_v27 = vsub.f32 %v1711_v49, %v1719_v55 }
 0xe09   :  { %v1724_v18 = vpop.xlane.xlu1 %1723  ;;  %v1718_v14 = vpop.xlane.xlu0 %1717 }
 0xe0a   :  { %v1727_v16 = vmul.f32 0.03125, %v1724_v18  ;;  %v1720_v19 = vmul.f32 0.03125, %v1718_v14 }
 0xe0c   :  { %v1731_v21 = vsub.f32 %v1727_v16, %v1729_v15  ;;  %v1730_v48 = vmul.f32 %v1720_v19, %v1720_v19  ;;  %v1734_v26 = vsub.f32 %v1712_v11, %v1720_v19 }
 0xe0d   :  { %v1726_v32 = vpop.xlane.xlu0 %1725 }
 0xe0e   :  { %v1735_v22 = vadd.f32 1e-05, %v1731_v21  ;;  %v1728_v58 = vmul.f32 0.03125, %v1726_v32 }
 0xe10   :  { %2235 = vrsqrt.f32 %v1735_v22  ;;  %v1732_v60 = vsub.f32 %v1728_v58, %v1730_v48 }
 0xe12   :  { %v1736_v23 = vadd.f32 1e-05, %v1732_v60 }
 0xe14   :  { %2237 = vrsqrt.f32 %v1736_v23 }
 0xe1d   :  { %v2236_v37 = vpop.eup %2235 }
 0xe1e   :  { %v1739_v24 = vmul.f32 %v2236_v37, %v1733_v27 }
 0xe20   :  { %v1747_v28 = vmul.f32 %v1844_v40, %v1739_v24 }
 0xe21   :  { %v2238_v20 = vpop.eup %2237 }
 0xe22   :  { %v1740_v29 = vmul.f32 %v2238_v20, %v1734_v26  ;;  %v1755_v30 = vadd.f32 %v1845_v25, %v1747_v28 }
 0xe24   :  { %v1748_v31 = vmul.f32 %v1844_v40, %v1740_v29  ;;  %1757 = vst [vmem:[#allocation2] sm:$0xff] %v1755_v30 }
 0xe26   :  { %v1756_v33 = vadd.f32 %v1845_v25, %v1748_v31 }
 0xe28   :  { %1758 = vst [vmem:[#allocation2 + $0x8] sm:$0xff] %v1756_v33 }
 0xe29   :  { %2250 = shalt.err (!%p2247_p4)
}
 0xe2a   :  { %s2270_s17 = smov 128  }
 0xe2b   :  { %1770 = dma.vmem_to_hbm [thread:$0]  %s1765_s25, 256, %s2844_s19, [#allocation3], %s2270_s17, %s2270_s17, %s2266_s20  }
 0xe2c   :  { %2259 = dma.done.wait [#allocation3], 256  }
 0xe2d   :  { %2260 = vsyncadd [#allocation3], 4294967040 }
 0xe2e   :  { %1774 = vsyncpa [#allocation3], 1 }

</bundles_post_ra>
